<compile_context>
chip_gen: v5e
topology: v5e:2x2
jax: 0.10.0
libtpu: 0.0.40
codegen_flags: <defaults>
</compile_context>

<pallas_src>
import math
import functools

import jax
import jax.numpy as jnp
from jax.experimental import pallas as pl
from jax.experimental.pallas import tpu as pltpu

# ----------------------------- config (consistent with the module) -----------
VOCAB = 50            # vocab_size
VOCAB_PAD = 128       # vocab padded to a full lane width (zero rows) for lane-dense stores
HIDDEN = 32           # bert_config['hidden_size']
N_LAYERS = 2          # bert_config['num_hidden_layers']
N_HEADS = 2           # bert_config['num_attention_heads']
HEAD_DIM = HIDDEN // N_HEADS
INTER = 64            # bert_config['intermediate_size']
MAX_POS = 16          # bert_config['max_position_embeddings']
LN_EPS = 1e-12        # BERT layer_norm_eps
PAD_IDX = 0
INIT_STD = 0.02
NEG_BIAS = -10000.0   # additive attention-mask bias (original BERT convention)


# ----------------------------- in-kernel helpers -----------------------------
def _layer_norm(x, g, b):
    mean = jnp.mean(x, axis=-1, keepdims=True)
    var = jnp.mean(jnp.square(x - mean), axis=-1, keepdims=True)
    return (x - mean) * jax.lax.rsqrt(var + LN_EPS) * g + b


def _gelu_tanh(x):
    # tanh-approximate GELU (runs on the EUP slot). Flagged numerics change vs.
    # the exact-erf HF default ("gelu"): max abs deviation ~1e-3.
    c = math.sqrt(2.0 / math.pi)
    return 0.5 * x * (1.0 + jnp.tanh(c * (x + 0.044715 * x * x * x)))


def _fast_recip(x):
    # EUP approximate reciprocal + one Newton step (near-exact, off the VPU path)
    r = pl.reciprocal(x, approx=True)
    return r * (2.0 - x * r)


# ----------------------------- single fused kernel ---------------------------
def bert4rec_fused_kernel(ids_ref, bias_ref, emb_ref, embt_ref, postok_ref,
                          elng_ref, elnb_ref,
                          wq_ref, bq_ref, wk_ref, bk_ref, wv_ref, bv_ref,
                          wao_ref, bao_ref, ln1g_ref, ln1b_ref,
                          wi_ref, bi_ref, wfo_ref, bfo_ref,
                          ln2g_ref, ln2b_ref,
                          logits_ref, *, seqs, seq, n_heads, head_dim, n_layers):
    nt = seqs * seq                      # token rows in this grid block
    vocab_pad = emb_ref.shape[0]

    # ---- embedding gather: one-hot @ table on the MXU (no XLA gather) -------
    # NOTE: ids outside [0, VOCAB_PAD) silently map to a zero embedding.
    ids = ids_ref[...]                                            # (nt, 1) int32
    vid = jax.lax.broadcasted_iota(jnp.int32, (nt, vocab_pad), 1)
    one_hot = (vid == ids).astype(jnp.float32)                    # (nt, Vp)
    x = jnp.dot(one_hot, emb_ref[...], preferred_element_type=jnp.float32)

    # ---- + (positional + token-type(0)) table, pre-combined host-side -------
    pos_s = postok_ref[0:seq, :]                                  # (S, H)
    x = x + jnp.concatenate([pos_s] * seqs, axis=0)               # seqs-1 sublane copies
    x = _layer_norm(x, elng_ref[...], elnb_ref[...])

    # ---- layer-invariant block-diagonal attention bias (built host-side) ----
    bias = bias_ref[...]                                          # (nh*nt, nh*nt)

    scale = 1.0 / math.sqrt(head_dim)
    for l in range(n_layers):                                     # static unroll (L=2)
        # per-head lane-aligned Q/K/V: (nt,H)@(H,dh) with leading-dim-indexed
        # weights (no sub-128-lane slicing), stacked into (nh*nt, dh) row blocks
        qs, ks, vs = [], [], []
        for h in range(n_heads):
            qs.append(jnp.dot(x, wq_ref[l, h],
                              preferred_element_type=jnp.float32) + bq_ref[l, h])
            ks.append(jnp.dot(x, wk_ref[l, h],
                              preferred_element_type=jnp.float32) + bk_ref[l, h])
            vs.append(jnp.dot(x, wv_ref[l, h],
                              preferred_element_type=jnp.float32) + bv_ref[l, h])
        q_big = jnp.concatenate(qs, axis=0)                       # (nh*nt, dh)
        k_big = jnp.concatenate(ks, axis=0)
        v_big = jnp.concatenate(vs, axis=0)

        # block-diagonal attention: 2 matmuls + 1 row softmax for ALL (b, h)
        s = jax.lax.dot_general(q_big, k_big, (((1,), (1,)), ((), ())),
                                preferred_element_type=jnp.float32)
        s = s * scale + bias                                       # off-block keys get -1e4
        s = s - jnp.max(s, axis=-1, keepdims=True)
        p = jnp.exp(s)                                             # off-block -> exactly 0.0
        p = p * _fast_recip(jnp.sum(p, axis=-1, keepdims=True))
        ctx = jnp.dot(p, v_big, preferred_element_type=jnp.float32)  # (nh*nt, dh)

        # attention-output dense accumulated per head (sublane-aligned slices,
        # replaces the old lane concat / per-batch Python-list accumulation)
        attn = bao_ref[l]
        for h in range(n_heads):
            attn = attn + jnp.dot(ctx[h * nt:(h + 1) * nt, :], wao_ref[l, h],
                                  preferred_element_type=jnp.float32)

        h1 = _layer_norm(attn + x, ln1g_ref[l], ln1b_ref[l])
        inter = _gelu_tanh(
            jnp.dot(h1, wi_ref[l], preferred_element_type=jnp.float32) + bi_ref[l])
        ffo = jnp.dot(inter, wfo_ref[l], preferred_element_type=jnp.float32) + bfo_ref[l]
        x = _layer_norm(ffo + h1, ln2g_ref[l], ln2b_ref[l])

    # ---- tied LM head: pre-transposed table -> plain (nt,H)@(H,128) ---------
    # Vp = 128 -> lane-dense, unmasked full-lane store.
    logits_ref[...] = jnp.dot(
        x, embt_ref[...], preferred_element_type=jnp.float32).astype(logits_ref.dtype)


# ----------------------------- wrapper ----------------------------------------
def bert4rec_forward(params, input_ids, attention_mask, *, seqs_per_block=None):
    B, S = input_ids.shape
    assert S <= MAX_POS, "sequence length exceeds max_position_embeddings"

    if seqs_per_block is None:
        # Target <= ~64 attention rows per grid block; must divide B evenly.
        max_bb = max(1, 64 // (N_HEADS * S))
        seqs_per_block = max(d for d in range(1, min(B, max_bb) + 1) if B % d == 0)
    bb = seqs_per_block
    nblk = B // bb
    nt = bb * S                       # token rows per grid block
    bhs = N_HEADS * nt                # attention rows per grid block
    n_tok = B * S

    ids2d = input_ids.reshape(n_tok, 1).astype(jnp.int32)
    mask_f = attention_mask.astype(jnp.float32)

    # Layer-invariant block-diagonal additive bias, one (bhs, bhs) slab per grid
    # block, row/col order (head, seq_in_block, position). Off-(batch,head)-block
    # entries get -10000 which underflows to exactly 0 after exp, reproducing the
    # per-(b,h) softmax of the reference (same convention HF uses for masked keys).
    m = mask_f.reshape(nblk, nt)                         # (nblk, bb*S), order (b, s)
    m_big = jnp.tile(m, (1, N_HEADS))                    # (nblk, bhs), order (h, b, s)
    g = jnp.arange(bhs) // S                             # (head, seq) group id per row
    same = (g[:, None] == g[None, :]).astype(jnp.float32)
    bias = (1.0 - same[None, :, :] * m_big[:, None, :]) * NEG_BIAS
    bias = bias.reshape(nblk * bhs, bhs)

    weight_args = (params["embed_pad"], params["embed_pad_t"], params["pos_tok"],
                   params["emb_ln_g"], params["emb_ln_b"],
                   params["wq"], params["bq"], params["wk"], params["bk"],
                   params["wv"], params["bv"], params["wao"], params["bao"],
                   params["ln1g"], params["ln1b"], params["wi"], params["bi"],
                   params["wfo"], params["bfo"], params["ln2g"], params["ln2b"])

    def _resident(a):                 # full array, VMEM-resident across the grid
        nd = a.ndim
        return pl.BlockSpec(a.shape, lambda i, nd=nd: (0,) * nd)

    kernel = functools.partial(
        bert4rec_fused_kernel, seqs=bb, seq=S,
        n_heads=N_HEADS, head_dim=HEAD_DIM, n_layers=N_LAYERS)

    logits_pad = pl.pallas_call(
        kernel,
        out_shape=jax.ShapeDtypeStruct((n_tok, VOCAB_PAD), jnp.float32),
        grid=(nblk,),
        in_specs=[pl.BlockSpec((nt, 1), lambda i: (i, 0)),        # ids, row-tiled
                  pl.BlockSpec((bhs, bhs), lambda i: (i, 0))]     # attn bias, row-tiled
                 + [_resident(a) for a in weight_args],
        out_specs=pl.BlockSpec((nt, VOCAB_PAD), lambda i: (i, 0)),
        compiler_params=pltpu.CompilerParams(
            dimension_semantics=("parallel",)),                   # shards blocks on v7x
    )(ids2d, bias, *weight_args)

    # slice the zero-weight padded vocab columns back off
    return logits_pad.reshape(B, S, VOCAB_PAD)[:, :, :VOCAB]


# ----------------------------- deterministic param init ----------------------
def init_params(key):
    def nrm(k, shape):
        return INIT_STD * jax.random.normal(k, shape, dtype=jnp.float32)

    ks = iter(jax.random.split(key, 12))

    embed = nrm(next(ks), (VOCAB, HIDDEN)).at[PAD_IDX].set(0.0)   # padding row zeroed
    embed_pad = jnp.zeros((VOCAB_PAD, HIDDEN), jnp.float32).at[:VOCAB].set(embed)

    pos = nrm(next(ks), (MAX_POS, HIDDEN))
    tok0 = nrm(next(ks), (1, HIDDEN))                             # token_type_ids == 0

    params = {
        "embed_pad": embed_pad,                                   # (Vp, H) gather table
        "embed_pad_t": jnp.transpose(embed_pad),                  # (H, Vp) tied LM head
        "pos_tok": pos + tok0,                                    # fused pos + token-type
        "emb_ln_g": jnp.ones((1, HIDDEN), jnp.float32),
        "emb_ln_b": jnp.zeros((1, HIDDEN), jnp.float32),
        # attention weights laid out per head so the kernel never lane-slices:
        "wq": nrm(next(ks), (N_LAYERS, N_HEADS, HIDDEN, HEAD_DIM)),
        "bq": jnp.zeros((N_LAYERS, N_HEADS, 1, HEAD_DIM), jnp.float32),
        "wk": nrm(next(ks), (N_LAYERS, N_HEADS, HIDDEN, HEAD_DIM)),
        "bk": jnp.zeros((N_LAYERS, N_HEADS, 1, HEAD_DIM), jnp.float32),
        "wv": nrm(next(ks), (N_LAYERS, N_HEADS, HIDDEN, HEAD_DIM)),
        "bv": jnp.zeros((N_LAYERS, N_HEADS, 1, HEAD_DIM), jnp.float32),
        "wao": nrm(next(ks), (N_LAYERS, N_HEADS, HEAD_DIM, HIDDEN)),
        "bao": jnp.zeros((N_LAYERS, 1, HIDDEN), jnp.float32),
        "ln1g": jnp.ones((N_LAYERS, 1, HIDDEN), jnp.float32),
        "ln1b": jnp.zeros((N_LAYERS, 1, HIDDEN), jnp.float32),
        "wi": nrm(next(ks), (N_LAYERS, HIDDEN, INTER)),
        "bi": jnp.zeros((N_LAYERS, 1, INTER), jnp.float32),
        "wfo": nrm(next(ks), (N_LAYERS, INTER, HIDDEN)),
        "bfo": jnp.zeros((N_LAYERS, 1, HIDDEN), jnp.float32),
        "ln2g": jnp.ones((N_LAYERS, 1, HIDDEN), jnp.float32),
        "ln2b": jnp.zeros((N_LAYERS, 1, HIDDEN), jnp.float32),
    }
    return params


# ----------------------------- main -------------------------------------------
if __name__ == "__main__":
    root = jax.random.PRNGKey(0)
    pkey, ikey, ikey2 = jax.random.split(root, 3)

    params = init_params(pkey)

    # Small shapes consistent with the module: batch=2, seq=8, hidden=32.
    B, S = 2, 8
    input_ids = jax.random.randint(ikey, (B, S), 1, VOCAB, dtype=jnp.int32)
    input_ids = input_ids.at[:, S - 2:].set(PAD_IDX)              # padded tail
    attention_mask = jnp.ones((B, S), jnp.int32).at[:, S - 2:].set(0)

    fwd = jax.jit(bert4rec_forward)
    out = jax.block_until_ready(fwd(params, input_ids, attention_mask))
    assert out.shape == (B, S, VOCAB), out.shape
    assert bool(jnp.all(jnp.isfinite(out))), "non-finite output"

    # Larger batch per call: exercises the multi-block grid path
    # (launch-overhead amortization; "parallel" axis shards blocks across the
    # two v7x TensorCores, neutral on single-TC v5e/v6e).
    B2 = 8
    ids2 = jax.random.randint(ikey2, (B2, S), 1, VOCAB, dtype=jnp.int32)
    mask2 = jnp.ones((B2, S), jnp.int32)
    out2 = jax.block_until_ready(fwd(params, ids2, mask2))
    assert out2.shape == (B2, S, VOCAB), out2.shape
    assert bool(jnp.all(jnp.isfinite(out2))), "non-finite output (batched run)"

    print("KERNEL_OK")
</pallas_src>

<mosaic_0001>
module attributes {stable_mosaic.version = 11 : i64} {
  func.func @bert4rec_fused_kernel(%arg0: i32, %arg1: memref<16x1xi32, #tpu.memory_space<vmem>>, %arg2: memref<32x32xf32, #tpu.memory_space<vmem>>, %arg3: memref<128x32xf32, #tpu.memory_space<vmem>>, %arg4: memref<32x128xf32, #tpu.memory_space<vmem>>, %arg5: memref<16x32xf32, #tpu.memory_space<vmem>>, %arg6: memref<1x32xf32, #tpu.memory_space<vmem>>, %arg7: memref<1x32xf32, #tpu.memory_space<vmem>>, %arg8: memref<2x2x32x16xf32, #tpu.memory_space<vmem>>, %arg9: memref<2x2x1x16xf32, #tpu.memory_space<vmem>>, %arg10: memref<2x2x32x16xf32, #tpu.memory_space<vmem>>, %arg11: memref<2x2x1x16xf32, #tpu.memory_space<vmem>>, %arg12: memref<2x2x32x16xf32, #tpu.memory_space<vmem>>, %arg13: memref<2x2x1x16xf32, #tpu.memory_space<vmem>>, %arg14: memref<2x2x16x32xf32, #tpu.memory_space<vmem>>, %arg15: memref<2x1x32xf32, #tpu.memory_space<vmem>>, %arg16: memref<2x1x32xf32, #tpu.memory_space<vmem>>, %arg17: memref<2x1x32xf32, #tpu.memory_space<vmem>>, %arg18: memref<2x32x64xf32, #tpu.memory_space<vmem>>, %arg19: memref<2x1x64xf32, #tpu.memory_space<vmem>>, %arg20: memref<2x64x32xf32, #tpu.memory_space<vmem>>, %arg21: memref<2x1x32xf32, #tpu.memory_space<vmem>>, %arg22: memref<2x1x32xf32, #tpu.memory_space<vmem>>, %arg23: memref<2x1x32xf32, #tpu.memory_space<vmem>>, %arg24: memref<16x128xf32, #tpu.memory_space<vmem>>) attributes {dimension_semantics = [#tpu.dimension_semantics<parallel>], iteration_bounds = array<i64: 1>, scalar_prefetch = 0 : i64, scratch_operands = 0 : i64, tpu.core_type = #tpu.core_type<tc>, window_params = [{transform_indices = @transform_0, window_bounds = array<i64: 16, 1>}, {transform_indices = @transform_1, window_bounds = array<i64: 32, 32>}, {pipeline_mode = #tpu.pipeline_mode<synchronous>, transform_indices = @transform_2, window_bounds = array<i64: 128, 32>}, {pipeline_mode = #tpu.pipeline_mode<synchronous>, transform_indices = @transform_3, window_bounds = array<i64: 32, 128>}, {pipeline_mode = #tpu.pipeline_mode<synchronous>, transform_indices = @transform_4, window_bounds = array<i64: 16, 32>}, {pipeline_mode = #tpu.pipeline_mode<synchronous>, transform_indices = @transform_5, window_bounds = array<i64: 1, 32>}, {pipeline_mode = #tpu.pipeline_mode<synchronous>, transform_indices = @transform_6, window_bounds = array<i64: 1, 32>}, {pipeline_mode = #tpu.pipeline_mode<synchronous>, transform_indices = @transform_7, window_bounds = array<i64: 2, 2, 32, 16>}, {pipeline_mode = #tpu.pipeline_mode<synchronous>, transform_indices = @transform_8, window_bounds = array<i64: 2, 2, 1, 16>}, {pipeline_mode = #tpu.pipeline_mode<synchronous>, transform_indices = @transform_9, window_bounds = array<i64: 2, 2, 32, 16>}, {pipeline_mode = #tpu.pipeline_mode<synchronous>, transform_indices = @transform_10, window_bounds = array<i64: 2, 2, 1, 16>}, {pipeline_mode = #tpu.pipeline_mode<synchronous>, transform_indices = @transform_11, window_bounds = array<i64: 2, 2, 32, 16>}, {pipeline_mode = #tpu.pipeline_mode<synchronous>, transform_indices = @transform_12, window_bounds = array<i64: 2, 2, 1, 16>}, {pipeline_mode = #tpu.pipeline_mode<synchronous>, transform_indices = @transform_13, window_bounds = array<i64: 2, 2, 16, 32>}, {pipeline_mode = #tpu.pipeline_mode<synchronous>, transform_indices = @transform_14, window_bounds = array<i64: 2, 1, 32>}, {pipeline_mode = #tpu.pipeline_mode<synchronous>, transform_indices = @transform_15, window_bounds = array<i64: 2, 1, 32>}, {pipeline_mode = #tpu.pipeline_mode<synchronous>, transform_indices = @transform_16, window_bounds = array<i64: 2, 1, 32>}, {pipeline_mode = #tpu.pipeline_mode<synchronous>, transform_indices = @transform_17, window_bounds = array<i64: 2, 32, 64>}, {pipeline_mode = #tpu.pipeline_mode<synchronous>, transform_indices = @transform_18, window_bounds = array<i64: 2, 1, 64>}, {pipeline_mode = #tpu.pipeline_mode<synchronous>, transform_indices = @transform_19, window_bounds = array<i64: 2, 64, 32>}, {pipeline_mode = #tpu.pipeline_mode<synchronous>, transform_indices = @transform_20, window_bounds = array<i64: 2, 1, 32>}, {pipeline_mode = #tpu.pipeline_mode<synchronous>, transform_indices = @transform_21, window_bounds = array<i64: 2, 1, 32>}, {pipeline_mode = #tpu.pipeline_mode<synchronous>, transform_indices = @transform_22, window_bounds = array<i64: 2, 1, 32>}, {transform_indices = @transform_23, window_bounds = array<i64: 16, 128>}]} {
    %c0 = arith.constant 0 : index
    %c0_0 = arith.constant 0 : index
    %0 = vector.load %arg1[%c0, %c0_0] : memref<16x1xi32, #tpu.memory_space<vmem>>, vector<16x1xi32>
    %1 = tpu.iota {dimensions = array<i32: 1>} : vector<16x128xi32>
    %2 = vector.broadcast %0 : vector<16x1xi32> to vector<16x128xi32>
    %3 = arith.cmpi eq, %1, %2 : vector<16x128xi32>
    %4 = arith.extui %3 : vector<16x128xi1> to vector<16x128xi32>
    %5 = arith.sitofp %4 : vector<16x128xi32> to vector<16x128xf32>
    %c0_1 = arith.constant 0 : index
    %c0_2 = arith.constant 0 : index
    %6 = vector.load %arg3[%c0_1, %c0_2] : memref<128x32xf32, #tpu.memory_space<vmem>>, vector<128x32xf32>
    %cst = arith.constant dense<0.000000e+00> : vector<16x32xf32>
    %7 = tpu.matmul %5, %6, %cst {dimension_numbers = #tpu.dot_dimension_numbers<[1], [0], [0], [1], [0, 0, 1, 1], [], []>} : vector<16x128xf32>, vector<128x32xf32>, vector<16x32xf32> -> vector<16x32xf32>
    %c0_3 = arith.constant 0 : index
    %c0_4 = arith.constant 0 : index
    %8 = vector.load %arg5[%c0_3, %c0_4] : memref<16x32xf32, #tpu.memory_space<vmem>>, vector<8x32xf32>
    %9 = tpu.concatenate %8, %8 in 0 : vector<8x32xf32>, vector<8x32xf32> -> vector<16x32xf32>
    %10 = arith.addf %7, %9 : vector<16x32xf32>
    %c0_5 = arith.constant 0 : index
    %c0_6 = arith.constant 0 : index
    %11 = vector.load %arg6[%c0_5, %c0_6] : memref<1x32xf32, #tpu.memory_space<vmem>>, vector<1x32xf32>
    %c0_7 = arith.constant 0 : index
    %c0_8 = arith.constant 0 : index
    %12 = vector.load %arg7[%c0_7, %c0_8] : memref<1x32xf32, #tpu.memory_space<vmem>>, vector<1x32xf32>
    %cst_9 = arith.constant dense<0.000000e+00> : vector<16xf32>
    %13 = vector.multi_reduction <add>, %10, %cst_9 [1] : vector<16x32xf32> to vector<16xf32>
    %14 = vector.shape_cast %13 : vector<16xf32> to vector<16x1xf32>
    %cst_10 = arith.constant 3.200000e+01 : f32
    %15 = vector.broadcast %cst_10 : f32 to vector<16x1xf32>
    %16 = arith.divf %14, %15 : vector<16x1xf32>
    %17 = vector.broadcast %16 : vector<16x1xf32> to vector<16x32xf32>
    %18 = arith.subf %10, %17 : vector<16x32xf32>
    %19 = arith.mulf %18, %18 : vector<16x32xf32>
    %cst_11 = arith.constant dense<0.000000e+00> : vector<16xf32>
    %20 = vector.multi_reduction <add>, %19, %cst_11 [1] : vector<16x32xf32> to vector<16xf32>
    %21 = vector.shape_cast %20 : vector<16xf32> to vector<16x1xf32>
    %cst_12 = arith.constant 3.200000e+01 : f32
    %22 = vector.broadcast %cst_12 : f32 to vector<16x1xf32>
    %23 = arith.divf %21, %22 : vector<16x1xf32>
    %24 = vector.broadcast %16 : vector<16x1xf32> to vector<16x32xf32>
    %25 = arith.subf %10, %24 : vector<16x32xf32>
    %cst_13 = arith.constant 9.99999996E-13 : f32
    %26 = vector.broadcast %cst_13 : f32 to vector<16x1xf32>
    %27 = arith.addf %23, %26 : vector<16x1xf32>
    %28 = math.rsqrt %27 : vector<16x1xf32>
    %29 = vector.broadcast %28 : vector<16x1xf32> to vector<16x32xf32>
    %30 = arith.mulf %25, %29 : vector<16x32xf32>
    %31 = vector.broadcast %11 : vector<1x32xf32> to vector<16x32xf32>
    %32 = arith.mulf %30, %31 : vector<16x32xf32>
    %33 = vector.broadcast %12 : vector<1x32xf32> to vector<16x32xf32>
    %34 = arith.addf %32, %33 : vector<16x32xf32>
    %c0_14 = arith.constant 0 : index
    %c0_15 = arith.constant 0 : index
    %35 = vector.load %arg2[%c0_14, %c0_15] : memref<32x32xf32, #tpu.memory_space<vmem>>, vector<32x32xf32>
    %c0_16 = arith.constant 0 : index
    %c0_17 = arith.constant 0 : index
    %c0_18 = arith.constant 0 : index
    %c0_19 = arith.constant 0 : index
    %36 = vector.load %arg8[%c0_16, %c0_17, %c0_18, %c0_19] : memref<2x2x32x16xf32, #tpu.memory_space<vmem>>, vector<1x1x32x16xf32>
    %37 = vector.shape_cast %36 : vector<1x1x32x16xf32> to vector<32x16xf32>
    %cst_20 = arith.constant dense<0.000000e+00> : vector<16x16xf32>
    %38 = tpu.matmul %34, %37, %cst_20 {dimension_numbers = #tpu.dot_dimension_numbers<[1], [0], [0], [1], [0, 0, 1, 1], [], []>} : vector<16x32xf32>, vector<32x16xf32>, vector<16x16xf32> -> vector<16x16xf32>
    %c0_21 = arith.constant 0 : index
    %c0_22 = arith.constant 0 : index
    %c0_23 = arith.constant 0 : index
    %c0_24 = arith.constant 0 : index
    %39 = vector.load %arg9[%c0_21, %c0_22, %c0_23, %c0_24] : memref<2x2x1x16xf32, #tpu.memory_space<vmem>>, vector<1x1x1x16xf32>
    %40 = vector.shape_cast %39 : vector<1x1x1x16xf32> to vector<1x16xf32>
    %41 = vector.broadcast %40 : vector<1x16xf32> to vector<16x16xf32>
    %42 = arith.addf %38, %41 : vector<16x16xf32>
    %c0_25 = arith.constant 0 : index
    %c0_26 = arith.constant 0 : index
    %c0_27 = arith.constant 0 : index
    %c0_28 = arith.constant 0 : index
    %43 = vector.load %arg10[%c0_25, %c0_26, %c0_27, %c0_28] : memref<2x2x32x16xf32, #tpu.memory_space<vmem>>, vector<1x1x32x16xf32>
    %44 = vector.shape_cast %43 : vector<1x1x32x16xf32> to vector<32x16xf32>
    %cst_29 = arith.constant dense<0.000000e+00> : vector<16x16xf32>
    %45 = tpu.matmul %34, %44, %cst_29 {dimension_numbers = #tpu.dot_dimension_numbers<[1], [0], [0], [1], [0, 0, 1, 1], [], []>} : vector<16x32xf32>, vector<32x16xf32>, vector<16x16xf32> -> vector<16x16xf32>
    %c0_30 = arith.constant 0 : index
    %c0_31 = arith.constant 0 : index
    %c0_32 = arith.constant 0 : index
    %c0_33 = arith.constant 0 : index
    %46 = vector.load %arg11[%c0_30, %c0_31, %c0_32, %c0_33] : memref<2x2x1x16xf32, #tpu.memory_space<vmem>>, vector<1x1x1x16xf32>
    %47 = vector.shape_cast %46 : vector<1x1x1x16xf32> to vector<1x16xf32>
    %48 = vector.broadcast %47 : vector<1x16xf32> to vector<16x16xf32>
    %49 = arith.addf %45, %48 : vector<16x16xf32>
    %c0_34 = arith.constant 0 : index
    %c0_35 = arith.constant 0 : index
    %c0_36 = arith.constant 0 : index
    %c0_37 = arith.constant 0 : index
    %50 = vector.load %arg12[%c0_34, %c0_35, %c0_36, %c0_37] : memref<2x2x32x16xf32, #tpu.memory_space<vmem>>, vector<1x1x32x16xf32>
    %51 = vector.shape_cast %50 : vector<1x1x32x16xf32> to vector<32x16xf32>
    %cst_38 = arith.constant dense<0.000000e+00> : vector<16x16xf32>
    %52 = tpu.matmul %34, %51, %cst_38 {dimension_numbers = #tpu.dot_dimension_numbers<[1], [0], [0], [1], [0, 0, 1, 1], [], []>} : vector<16x32xf32>, vector<32x16xf32>, vector<16x16xf32> -> vector<16x16xf32>
    %c0_39 = arith.constant 0 : index
    %c0_40 = arith.constant 0 : index
    %c0_41 = arith.constant 0 : index
    %c0_42 = arith.constant 0 : index
    %53 = vector.load %arg13[%c0_39, %c0_40, %c0_41, %c0_42] : memref<2x2x1x16xf32, #tpu.memory_space<vmem>>, vector<1x1x1x16xf32>
    %54 = vector.shape_cast %53 : vector<1x1x1x16xf32> to vector<1x16xf32>
    %55 = vector.broadcast %54 : vector<1x16xf32> to vector<16x16xf32>
    %56 = arith.addf %52, %55 : vector<16x16xf32>
    %c0_43 = arith.constant 0 : index
    %c1 = arith.constant 1 : index
    %c0_44 = arith.constant 0 : index
    %c0_45 = arith.constant 0 : index
    %57 = vector.load %arg8[%c0_43, %c1, %c0_44, %c0_45] : memref<2x2x32x16xf32, #tpu.memory_space<vmem>>, vector<1x1x32x16xf32>
    %58 = vector.shape_cast %57 : vector<1x1x32x16xf32> to vector<32x16xf32>
    %cst_46 = arith.constant dense<0.000000e+00> : vector<16x16xf32>
    %59 = tpu.matmul %34, %58, %cst_46 {dimension_numbers = #tpu.dot_dimension_numbers<[1], [0], [0], [1], [0, 0, 1, 1], [], []>} : vector<16x32xf32>, vector<32x16xf32>, vector<16x16xf32> -> vector<16x16xf32>
    %c0_47 = arith.constant 0 : index
    %c1_48 = arith.constant 1 : index
    %c0_49 = arith.constant 0 : index
    %c0_50 = arith.constant 0 : index
    %60 = vector.load %arg9[%c0_47, %c1_48, %c0_49, %c0_50] : memref<2x2x1x16xf32, #tpu.memory_space<vmem>>, vector<1x1x1x16xf32>
    %61 = vector.shape_cast %60 : vector<1x1x1x16xf32> to vector<1x16xf32>
    %62 = vector.broadcast %61 : vector<1x16xf32> to vector<16x16xf32>
    %63 = arith.addf %59, %62 : vector<16x16xf32>
    %c0_51 = arith.constant 0 : index
    %c1_52 = arith.constant 1 : index
    %c0_53 = arith.constant 0 : index
    %c0_54 = arith.constant 0 : index
    %64 = vector.load %arg10[%c0_51, %c1_52, %c0_53, %c0_54] : memref<2x2x32x16xf32, #tpu.memory_space<vmem>>, vector<1x1x32x16xf32>
    %65 = vector.shape_cast %64 : vector<1x1x32x16xf32> to vector<32x16xf32>
    %cst_55 = arith.constant dense<0.000000e+00> : vector<16x16xf32>
    %66 = tpu.matmul %34, %65, %cst_55 {dimension_numbers = #tpu.dot_dimension_numbers<[1], [0], [0], [1], [0, 0, 1, 1], [], []>} : vector<16x32xf32>, vector<32x16xf32>, vector<16x16xf32> -> vector<16x16xf32>
    %c0_56 = arith.constant 0 : index
    %c1_57 = arith.constant 1 : index
    %c0_58 = arith.constant 0 : index
    %c0_59 = arith.constant 0 : index
    %67 = vector.load %arg11[%c0_56, %c1_57, %c0_58, %c0_59] : memref<2x2x1x16xf32, #tpu.memory_space<vmem>>, vector<1x1x1x16xf32>
    %68 = vector.shape_cast %67 : vector<1x1x1x16xf32> to vector<1x16xf32>
    %69 = vector.broadcast %68 : vector<1x16xf32> to vector<16x16xf32>
    %70 = arith.addf %66, %69 : vector<16x16xf32>
    %c0_60 = arith.constant 0 : index
    %c1_61 = arith.constant 1 : index
    %c0_62 = arith.constant 0 : index
    %c0_63 = arith.constant 0 : index
    %71 = vector.load %arg12[%c0_60, %c1_61, %c0_62, %c0_63] : memref<2x2x32x16xf32, #tpu.memory_space<vmem>>, vector<1x1x32x16xf32>
    %72 = vector.shape_cast %71 : vector<1x1x32x16xf32> to vector<32x16xf32>
    %cst_64 = arith.constant dense<0.000000e+00> : vector<16x16xf32>
    %73 = tpu.matmul %34, %72, %cst_64 {dimension_numbers = #tpu.dot_dimension_numbers<[1], [0], [0], [1], [0, 0, 1, 1], [], []>} : vector<16x32xf32>, vector<32x16xf32>, vector<16x16xf32> -> vector<16x16xf32>
    %c0_65 = arith.constant 0 : index
    %c1_66 = arith.constant 1 : index
    %c0_67 = arith.constant 0 : index
    %c0_68 = arith.constant 0 : index
    %74 = vector.load %arg13[%c0_65, %c1_66, %c0_67, %c0_68] : memref<2x2x1x16xf32, #tpu.memory_space<vmem>>, vector<1x1x1x16xf32>
    %75 = vector.shape_cast %74 : vector<1x1x1x16xf32> to vector<1x16xf32>
    %76 = vector.broadcast %75 : vector<1x16xf32> to vector<16x16xf32>
    %77 = arith.addf %73, %76 : vector<16x16xf32>
    %78 = tpu.concatenate %42, %63 in 0 : vector<16x16xf32>, vector<16x16xf32> -> vector<32x16xf32>
    %79 = tpu.concatenate %49, %70 in 0 : vector<16x16xf32>, vector<16x16xf32> -> vector<32x16xf32>
    %80 = tpu.concatenate %56, %77 in 0 : vector<16x16xf32>, vector<16x16xf32> -> vector<32x16xf32>
    %cst_69 = arith.constant dense<0.000000e+00> : vector<32x32xf32>
    %81 = tpu.matmul %78, %79, %cst_69 {dimension_numbers = #tpu.dot_dimension_numbers<[1], [1], [0], [0], [0, 0, 1, 0], [], []>} : vector<32x16xf32>, vector<32x16xf32>, vector<32x32xf32> -> vector<32x32xf32>
    %cst_70 = arith.constant 2.500000e-01 : f32
    %82 = vector.broadcast %cst_70 : f32 to vector<32x32xf32>
    %83 = arith.mulf %81, %82 : vector<32x32xf32>
    %84 = arith.addf %83, %35 : vector<32x32xf32>
    %cst_71 = arith.constant dense<0xFF800000> : vector<32xf32>
    %85 = vector.multi_reduction <maximumf>, %84, %cst_71 [1] : vector<32x32xf32> to vector<32xf32>
    %86 = vector.shape_cast %85 : vector<32xf32> to vector<32x1xf32>
    %87 = vector.broadcast %86 : vector<32x1xf32> to vector<32x32xf32>
    %88 = arith.subf %84, %87 : vector<32x32xf32>
    %89 = math.exp %88 : vector<32x32xf32>
    %cst_72 = arith.constant dense<0.000000e+00> : vector<32xf32>
    %90 = vector.multi_reduction <add>, %89, %cst_72 [1] : vector<32x32xf32> to vector<32xf32>
    %91 = vector.shape_cast %90 : vector<32xf32> to vector<32x1xf32>
    %92 = tpu.reciprocal %91 {approx = true} : vector<32x1xf32> -> vector<32x1xf32>
    %93 = arith.mulf %91, %92 : vector<32x1xf32>
    %cst_73 = arith.constant 2.000000e+00 : f32
    %94 = vector.broadcast %cst_73 : f32 to vector<32x1xf32>
    %95 = arith.subf %94, %93 : vector<32x1xf32>
    %96 = arith.mulf %92, %95 : vector<32x1xf32>
    %97 = vector.broadcast %96 : vector<32x1xf32> to vector<32x32xf32>
    %98 = arith.mulf %89, %97 : vector<32x32xf32>
    %cst_74 = arith.constant dense<0.000000e+00> : vector<32x16xf32>
    %99 = tpu.matmul %98, %80, %cst_74 {dimension_numbers = #tpu.dot_dimension_numbers<[1], [0], [0], [1], [0, 0, 1, 1], [], []>} : vector<32x32xf32>, vector<32x16xf32>, vector<32x16xf32> -> vector<32x16xf32>
    %c0_75 = arith.constant 0 : index
    %c0_76 = arith.constant 0 : index
    %c0_77 = arith.constant 0 : index
    %100 = vector.load %arg15[%c0_75, %c0_76, %c0_77] : memref<2x1x32xf32, #tpu.memory_space<vmem>>, vector<1x1x32xf32>
    %101 = vector.shape_cast %100 : vector<1x1x32xf32> to vector<1x32xf32>
    %102 = vector.extract_strided_slice %99 {offsets = [0, 0], sizes = [16, 16], strides = [1, 1]} : vector<32x16xf32> to vector<16x16xf32>
    %c0_78 = arith.constant 0 : index
    %c0_79 = arith.constant 0 : index
    %c0_80 = arith.constant 0 : index
    %c0_81 = arith.constant 0 : index
    %103 = vector.load %arg14[%c0_78, %c0_79, %c0_80, %c0_81] : memref<2x2x16x32xf32, #tpu.memory_space<vmem>>, vector<1x1x16x32xf32>
    %104 = vector.shape_cast %103 : vector<1x1x16x32xf32> to vector<16x32xf32>
    %cst_82 = arith.constant dense<0.000000e+00> : vector<16x32xf32>
    %105 = tpu.matmul %102, %104, %cst_82 {dimension_numbers = #tpu.dot_dimension_numbers<[1], [0], [0], [1], [0, 0, 1, 1], [], []>} : vector<16x16xf32>, vector<16x32xf32>, vector<16x32xf32> -> vector<16x32xf32>
    %106 = vector.broadcast %101 : vector<1x32xf32> to vector<16x32xf32>
    %107 = arith.addf %106, %105 : vector<16x32xf32>
    %108 = vector.extract_strided_slice %99 {offsets = [16, 0], sizes = [16, 16], strides = [1, 1]} : vector<32x16xf32> to vector<16x16xf32>
    %c0_83 = arith.constant 0 : index
    %c1_84 = arith.constant 1 : index
    %c0_85 = arith.constant 0 : index
    %c0_86 = arith.constant 0 : index
    %109 = vector.load %arg14[%c0_83, %c1_84, %c0_85, %c0_86] : memref<2x2x16x32xf32, #tpu.memory_space<vmem>>, vector<1x1x16x32xf32>
    %110 = vector.shape_cast %109 : vector<1x1x16x32xf32> to vector<16x32xf32>
    %cst_87 = arith.constant dense<0.000000e+00> : vector<16x32xf32>
    %111 = tpu.matmul %108, %110, %cst_87 {dimension_numbers = #tpu.dot_dimension_numbers<[1], [0], [0], [1], [0, 0, 1, 1], [], []>} : vector<16x16xf32>, vector<16x32xf32>, vector<16x32xf32> -> vector<16x32xf32>
    %112 = arith.addf %107, %111 : vector<16x32xf32>
    %113 = arith.addf %112, %34 : vector<16x32xf32>
    %c0_88 = arith.constant 0 : index
    %c0_89 = arith.constant 0 : index
    %c0_90 = arith.constant 0 : index
    %114 = vector.load %arg16[%c0_88, %c0_89, %c0_90] : memref<2x1x32xf32, #tpu.memory_space<vmem>>, vector<1x1x32xf32>
    %115 = vector.shape_cast %114 : vector<1x1x32xf32> to vector<1x32xf32>
    %c0_91 = arith.constant 0 : index
    %c0_92 = arith.constant 0 : index
    %c0_93 = arith.constant 0 : index
    %116 = vector.load %arg17[%c0_91, %c0_92, %c0_93] : memref<2x1x32xf32, #tpu.memory_space<vmem>>, vector<1x1x32xf32>
    %117 = vector.shape_cast %116 : vector<1x1x32xf32> to vector<1x32xf32>
    %cst_94 = arith.constant dense<0.000000e+00> : vector<16xf32>
    %118 = vector.multi_reduction <add>, %113, %cst_94 [1] : vector<16x32xf32> to vector<16xf32>
    %119 = vector.shape_cast %118 : vector<16xf32> to vector<16x1xf32>
    %cst_95 = arith.constant 3.200000e+01 : f32
    %120 = vector.broadcast %cst_95 : f32 to vector<16x1xf32>
    %121 = arith.divf %119, %120 : vector<16x1xf32>
    %122 = vector.broadcast %121 : vector<16x1xf32> to vector<16x32xf32>
    %123 = arith.subf %113, %122 : vector<16x32xf32>
    %124 = arith.mulf %123, %123 : vector<16x32xf32>
    %cst_96 = arith.constant dense<0.000000e+00> : vector<16xf32>
    %125 = vector.multi_reduction <add>, %124, %cst_96 [1] : vector<16x32xf32> to vector<16xf32>
    %126 = vector.shape_cast %125 : vector<16xf32> to vector<16x1xf32>
    %cst_97 = arith.constant 3.200000e+01 : f32
    %127 = vector.broadcast %cst_97 : f32 to vector<16x1xf32>
    %128 = arith.divf %126, %127 : vector<16x1xf32>
    %129 = vector.broadcast %121 : vector<16x1xf32> to vector<16x32xf32>
    %130 = arith.subf %113, %129 : vector<16x32xf32>
    %cst_98 = arith.constant 9.99999996E-13 : f32
    %131 = vector.broadcast %cst_98 : f32 to vector<16x1xf32>
    %132 = arith.addf %128, %131 : vector<16x1xf32>
    %133 = math.rsqrt %132 : vector<16x1xf32>
    %134 = vector.broadcast %133 : vector<16x1xf32> to vector<16x32xf32>
    %135 = arith.mulf %130, %134 : vector<16x32xf32>
    %136 = vector.broadcast %115 : vector<1x32xf32> to vector<16x32xf32>
    %137 = arith.mulf %135, %136 : vector<16x32xf32>
    %138 = vector.broadcast %117 : vector<1x32xf32> to vector<16x32xf32>
    %139 = arith.addf %137, %138 : vector<16x32xf32>
    %c0_99 = arith.constant 0 : index
    %c0_100 = arith.constant 0 : index
    %c0_101 = arith.constant 0 : index
    %140 = vector.load %arg18[%c0_99, %c0_100, %c0_101] : memref<2x32x64xf32, #tpu.memory_space<vmem>>, vector<1x32x64xf32>
    %141 = vector.shape_cast %140 : vector<1x32x64xf32> to vector<32x64xf32>
    %cst_102 = arith.constant dense<0.000000e+00> : vector<16x64xf32>
    %142 = tpu.matmul %139, %141, %cst_102 {dimension_numbers = #tpu.dot_dimension_numbers<[1], [0], [0], [1], [0, 0, 1, 1], [], []>} : vector<16x32xf32>, vector<32x64xf32>, vector<16x64xf32> -> vector<16x64xf32>
    %c0_103 = arith.constant 0 : index
    %c0_104 = arith.constant 0 : index
    %c0_105 = arith.constant 0 : index
    %143 = vector.load %arg19[%c0_103, %c0_104, %c0_105] : memref<2x1x64xf32, #tpu.memory_space<vmem>>, vector<1x1x64xf32>
    %144 = vector.shape_cast %143 : vector<1x1x64xf32> to vector<1x64xf32>
    %145 = vector.broadcast %144 : vector<1x64xf32> to vector<16x64xf32>
    %146 = arith.addf %142, %145 : vector<16x64xf32>
    %cst_106 = arith.constant 5.000000e-01 : f32
    %147 = vector.broadcast %cst_106 : f32 to vector<16x64xf32>
    %148 = arith.mulf %147, %146 : vector<16x64xf32>
    %cst_107 = arith.constant 4.471500e-02 : f32
    %149 = vector.broadcast %cst_107 : f32 to vector<16x64xf32>
    %150 = arith.mulf %149, %146 : vector<16x64xf32>
    %151 = arith.mulf %150, %146 : vector<16x64xf32>
    %152 = arith.mulf %151, %146 : vector<16x64xf32>
    %153 = arith.addf %146, %152 : vector<16x64xf32>
    %cst_108 = arith.constant 0.797884583 : f32
    %154 = vector.broadcast %cst_108 : f32 to vector<16x64xf32>
    %155 = arith.mulf %154, %153 : vector<16x64xf32>
    %156 = math.tanh %155 : vector<16x64xf32>
    %cst_109 = arith.constant 1.000000e+00 : f32
    %157 = vector.broadcast %cst_109 : f32 to vector<16x64xf32>
    %158 = arith.addf %157, %156 : vector<16x64xf32>
    %159 = arith.mulf %148, %158 : vector<16x64xf32>
    %c0_110 = arith.constant 0 : index
    %c0_111 = arith.constant 0 : index
    %c0_112 = arith.constant 0 : index
    %160 = vector.load %arg20[%c0_110, %c0_111, %c0_112] : memref<2x64x32xf32, #tpu.memory_space<vmem>>, vector<1x64x32xf32>
    %161 = vector.shape_cast %160 : vector<1x64x32xf32> to vector<64x32xf32>
    %cst_113 = arith.constant dense<0.000000e+00> : vector<16x32xf32>
    %162 = tpu.matmul %159, %161, %cst_113 {dimension_numbers = #tpu.dot_dimension_numbers<[1], [0], [0], [1], [0, 0, 1, 1], [], []>} : vector<16x64xf32>, vector<64x32xf32>, vector<16x32xf32> -> vector<16x32xf32>
    %c0_114 = arith.constant 0 : index
    %c0_115 = arith.constant 0 : index
    %c0_116 = arith.constant 0 : index
    %163 = vector.load %arg21[%c0_114, %c0_115, %c0_116] : memref<2x1x32xf32, #tpu.memory_space<vmem>>, vector<1x1x32xf32>
    %164 = vector.shape_cast %163 : vector<1x1x32xf32> to vector<1x32xf32>
    %165 = vector.broadcast %164 : vector<1x32xf32> to vector<16x32xf32>
    %166 = arith.addf %162, %165 : vector<16x32xf32>
    %167 = arith.addf %166, %139 : vector<16x32xf32>
    %c0_117 = arith.constant 0 : index
    %c0_118 = arith.constant 0 : index
    %c0_119 = arith.constant 0 : index
    %168 = vector.load %arg22[%c0_117, %c0_118, %c0_119] : memref<2x1x32xf32, #tpu.memory_space<vmem>>, vector<1x1x32xf32>
    %169 = vector.shape_cast %168 : vector<1x1x32xf32> to vector<1x32xf32>
    %c0_120 = arith.constant 0 : index
    %c0_121 = arith.constant 0 : index
    %c0_122 = arith.constant 0 : index
    %170 = vector.load %arg23[%c0_120, %c0_121, %c0_122] : memref<2x1x32xf32, #tpu.memory_space<vmem>>, vector<1x1x32xf32>
    %171 = vector.shape_cast %170 : vector<1x1x32xf32> to vector<1x32xf32>
    %cst_123 = arith.constant dense<0.000000e+00> : vector<16xf32>
    %172 = vector.multi_reduction <add>, %167, %cst_123 [1] : vector<16x32xf32> to vector<16xf32>
    %173 = vector.shape_cast %172 : vector<16xf32> to vector<16x1xf32>
    %cst_124 = arith.constant 3.200000e+01 : f32
    %174 = vector.broadcast %cst_124 : f32 to vector<16x1xf32>
    %175 = arith.divf %173, %174 : vector<16x1xf32>
    %176 = vector.broadcast %175 : vector<16x1xf32> to vector<16x32xf32>
    %177 = arith.subf %167, %176 : vector<16x32xf32>
    %178 = arith.mulf %177, %177 : vector<16x32xf32>
    %cst_125 = arith.constant dense<0.000000e+00> : vector<16xf32>
    %179 = vector.multi_reduction <add>, %178, %cst_125 [1] : vector<16x32xf32> to vector<16xf32>
    %180 = vector.shape_cast %179 : vector<16xf32> to vector<16x1xf32>
    %cst_126 = arith.constant 3.200000e+01 : f32
    %181 = vector.broadcast %cst_126 : f32 to vector<16x1xf32>
    %182 = arith.divf %180, %181 : vector<16x1xf32>
    %183 = vector.broadcast %175 : vector<16x1xf32> to vector<16x32xf32>
    %184 = arith.subf %167, %183 : vector<16x32xf32>
    %cst_127 = arith.constant 9.99999996E-13 : f32
    %185 = vector.broadcast %cst_127 : f32 to vector<16x1xf32>
    %186 = arith.addf %182, %185 : vector<16x1xf32>
    %187 = math.rsqrt %186 : vector<16x1xf32>
    %188 = vector.broadcast %187 : vector<16x1xf32> to vector<16x32xf32>
    %189 = arith.mulf %184, %188 : vector<16x32xf32>
    %190 = vector.broadcast %169 : vector<1x32xf32> to vector<16x32xf32>
    %191 = arith.mulf %189, %190 : vector<16x32xf32>
    %192 = vector.broadcast %171 : vector<1x32xf32> to vector<16x32xf32>
    %193 = arith.addf %191, %192 : vector<16x32xf32>
    %c1_128 = arith.constant 1 : index
    %c0_129 = arith.constant 0 : index
    %c0_130 = arith.constant 0 : index
    %c0_131 = arith.constant 0 : index
    %194 = vector.load %arg8[%c1_128, %c0_129, %c0_130, %c0_131] : memref<2x2x32x16xf32, #tpu.memory_space<vmem>>, vector<1x1x32x16xf32>
    %195 = vector.shape_cast %194 : vector<1x1x32x16xf32> to vector<32x16xf32>
    %cst_132 = arith.constant dense<0.000000e+00> : vector<16x16xf32>
    %196 = tpu.matmul %193, %195, %cst_132 {dimension_numbers = #tpu.dot_dimension_numbers<[1], [0], [0], [1], [0, 0, 1, 1], [], []>} : vector<16x32xf32>, vector<32x16xf32>, vector<16x16xf32> -> vector<16x16xf32>
    %c1_133 = arith.constant 1 : index
    %c0_134 = arith.constant 0 : index
    %c0_135 = arith.constant 0 : index
    %c0_136 = arith.constant 0 : index
    %197 = vector.load %arg9[%c1_133, %c0_134, %c0_135, %c0_136] : memref<2x2x1x16xf32, #tpu.memory_space<vmem>>, vector<1x1x1x16xf32>
    %198 = vector.shape_cast %197 : vector<1x1x1x16xf32> to vector<1x16xf32>
    %199 = vector.broadcast %198 : vector<1x16xf32> to vector<16x16xf32>
    %200 = arith.addf %196, %199 : vector<16x16xf32>
    %c1_137 = arith.constant 1 : index
    %c0_138 = arith.constant 0 : index
    %c0_139 = arith.constant 0 : index
    %c0_140 = arith.constant 0 : index
    %201 = vector.load %arg10[%c1_137, %c0_138, %c0_139, %c0_140] : memref<2x2x32x16xf32, #tpu.memory_space<vmem>>, vector<1x1x32x16xf32>
    %202 = vector.shape_cast %201 : vector<1x1x32x16xf32> to vector<32x16xf32>
    %cst_141 = arith.constant dense<0.000000e+00> : vector<16x16xf32>
    %203 = tpu.matmul %193, %202, %cst_141 {dimension_numbers = #tpu.dot_dimension_numbers<[1], [0], [0], [1], [0, 0, 1, 1], [], []>} : vector<16x32xf32>, vector<32x16xf32>, vector<16x16xf32> -> vector<16x16xf32>
    %c1_142 = arith.constant 1 : index
    %c0_143 = arith.constant 0 : index
    %c0_144 = arith.constant 0 : index
    %c0_145 = arith.constant 0 : index
    %204 = vector.load %arg11[%c1_142, %c0_143, %c0_144, %c0_145] : memref<2x2x1x16xf32, #tpu.memory_space<vmem>>, vector<1x1x1x16xf32>
    %205 = vector.shape_cast %204 : vector<1x1x1x16xf32> to vector<1x16xf32>
    %206 = vector.broadcast %205 : vector<1x16xf32> to vector<16x16xf32>
    %207 = arith.addf %203, %206 : vector<16x16xf32>
    %c1_146 = arith.constant 1 : index
    %c0_147 = arith.constant 0 : index
    %c0_148 = arith.constant 0 : index
    %c0_149 = arith.constant 0 : index
    %208 = vector.load %arg12[%c1_146, %c0_147, %c0_148, %c0_149] : memref<2x2x32x16xf32, #tpu.memory_space<vmem>>, vector<1x1x32x16xf32>
    %209 = vector.shape_cast %208 : vector<1x1x32x16xf32> to vector<32x16xf32>
    %cst_150 = arith.constant dense<0.000000e+00> : vector<16x16xf32>
    %210 = tpu.matmul %193, %209, %cst_150 {dimension_numbers = #tpu.dot_dimension_numbers<[1], [0], [0], [1], [0, 0, 1, 1], [], []>} : vector<16x32xf32>, vector<32x16xf32>, vector<16x16xf32> -> vector<16x16xf32>
    %c1_151 = arith.constant 1 : index
    %c0_152 = arith.constant 0 : index
    %c0_153 = arith.constant 0 : index
    %c0_154 = arith.constant 0 : index
    %211 = vector.load %arg13[%c1_151, %c0_152, %c0_153, %c0_154] : memref<2x2x1x16xf32, #tpu.memory_space<vmem>>, vector<1x1x1x16xf32>
    %212 = vector.shape_cast %211 : vector<1x1x1x16xf32> to vector<1x16xf32>
    %213 = vector.broadcast %212 : vector<1x16xf32> to vector<16x16xf32>
    %214 = arith.addf %210, %213 : vector<16x16xf32>
    %c1_155 = arith.constant 1 : index
    %c1_156 = arith.constant 1 : index
    %c0_157 = arith.constant 0 : index
    %c0_158 = arith.constant 0 : index
    %215 = vector.load %arg8[%c1_155, %c1_156, %c0_157, %c0_158] : memref<2x2x32x16xf32, #tpu.memory_space<vmem>>, vector<1x1x32x16xf32>
    %216 = vector.shape_cast %215 : vector<1x1x32x16xf32> to vector<32x16xf32>
    %cst_159 = arith.constant dense<0.000000e+00> : vector<16x16xf32>
    %217 = tpu.matmul %193, %216, %cst_159 {dimension_numbers = #tpu.dot_dimension_numbers<[1], [0], [0], [1], [0, 0, 1, 1], [], []>} : vector<16x32xf32>, vector<32x16xf32>, vector<16x16xf32> -> vector<16x16xf32>
    %c1_160 = arith.constant 1 : index
    %c1_161 = arith.constant 1 : index
    %c0_162 = arith.constant 0 : index
    %c0_163 = arith.constant 0 : index
    %218 = vector.load %arg9[%c1_160, %c1_161, %c0_162, %c0_163] : memref<2x2x1x16xf32, #tpu.memory_space<vmem>>, vector<1x1x1x16xf32>
    %219 = vector.shape_cast %218 : vector<1x1x1x16xf32> to vector<1x16xf32>
    %220 = vector.broadcast %219 : vector<1x16xf32> to vector<16x16xf32>
    %221 = arith.addf %217, %220 : vector<16x16xf32>
    %c1_164 = arith.constant 1 : index
    %c1_165 = arith.constant 1 : index
    %c0_166 = arith.constant 0 : index
    %c0_167 = arith.constant 0 : index
    %222 = vector.load %arg10[%c1_164, %c1_165, %c0_166, %c0_167] : memref<2x2x32x16xf32, #tpu.memory_space<vmem>>, vector<1x1x32x16xf32>
    %223 = vector.shape_cast %222 : vector<1x1x32x16xf32> to vector<32x16xf32>
    %cst_168 = arith.constant dense<0.000000e+00> : vector<16x16xf32>
    %224 = tpu.matmul %193, %223, %cst_168 {dimension_numbers = #tpu.dot_dimension_numbers<[1], [0], [0], [1], [0, 0, 1, 1], [], []>} : vector<16x32xf32>, vector<32x16xf32>, vector<16x16xf32> -> vector<16x16xf32>
    %c1_169 = arith.constant 1 : index
    %c1_170 = arith.constant 1 : index
    %c0_171 = arith.constant 0 : index
    %c0_172 = arith.constant 0 : index
    %225 = vector.load %arg11[%c1_169, %c1_170, %c0_171, %c0_172] : memref<2x2x1x16xf32, #tpu.memory_space<vmem>>, vector<1x1x1x16xf32>
    %226 = vector.shape_cast %225 : vector<1x1x1x16xf32> to vector<1x16xf32>
    %227 = vector.broadcast %226 : vector<1x16xf32> to vector<16x16xf32>
    %228 = arith.addf %224, %227 : vector<16x16xf32>
    %c1_173 = arith.constant 1 : index
    %c1_174 = arith.constant 1 : index
    %c0_175 = arith.constant 0 : index
    %c0_176 = arith.constant 0 : index
    %229 = vector.load %arg12[%c1_173, %c1_174, %c0_175, %c0_176] : memref<2x2x32x16xf32, #tpu.memory_space<vmem>>, vector<1x1x32x16xf32>
    %230 = vector.shape_cast %229 : vector<1x1x32x16xf32> to vector<32x16xf32>
    %cst_177 = arith.constant dense<0.000000e+00> : vector<16x16xf32>
    %231 = tpu.matmul %193, %230, %cst_177 {dimension_numbers = #tpu.dot_dimension_numbers<[1], [0], [0], [1], [0, 0, 1, 1], [], []>} : vector<16x32xf32>, vector<32x16xf32>, vector<16x16xf32> -> vector<16x16xf32>
    %c1_178 = arith.constant 1 : index
    %c1_179 = arith.constant 1 : index
    %c0_180 = arith.constant 0 : index
    %c0_181 = arith.constant 0 : index
    %232 = vector.load %arg13[%c1_178, %c1_179, %c0_180, %c0_181] : memref<2x2x1x16xf32, #tpu.memory_space<vmem>>, vector<1x1x1x16xf32>
    %233 = vector.shape_cast %232 : vector<1x1x1x16xf32> to vector<1x16xf32>
    %234 = vector.broadcast %233 : vector<1x16xf32> to vector<16x16xf32>
    %235 = arith.addf %231, %234 : vector<16x16xf32>
    %236 = tpu.concatenate %200, %221 in 0 : vector<16x16xf32>, vector<16x16xf32> -> vector<32x16xf32>
    %237 = tpu.concatenate %207, %228 in 0 : vector<16x16xf32>, vector<16x16xf32> -> vector<32x16xf32>
    %238 = tpu.concatenate %214, %235 in 0 : vector<16x16xf32>, vector<16x16xf32> -> vector<32x16xf32>
    %cst_182 = arith.constant dense<0.000000e+00> : vector<32x32xf32>
    %239 = tpu.matmul %236, %237, %cst_182 {dimension_numbers = #tpu.dot_dimension_numbers<[1], [1], [0], [0], [0, 0, 1, 0], [], []>} : vector<32x16xf32>, vector<32x16xf32>, vector<32x32xf32> -> vector<32x32xf32>
    %cst_183 = arith.constant 2.500000e-01 : f32
    %240 = vector.broadcast %cst_183 : f32 to vector<32x32xf32>
    %241 = arith.mulf %239, %240 : vector<32x32xf32>
    %242 = arith.addf %241, %35 : vector<32x32xf32>
    %cst_184 = arith.constant dense<0xFF800000> : vector<32xf32>
    %243 = vector.multi_reduction <maximumf>, %242, %cst_184 [1] : vector<32x32xf32> to vector<32xf32>
    %244 = vector.shape_cast %243 : vector<32xf32> to vector<32x1xf32>
    %245 = vector.broadcast %244 : vector<32x1xf32> to vector<32x32xf32>
    %246 = arith.subf %242, %245 : vector<32x32xf32>
    %247 = math.exp %246 : vector<32x32xf32>
    %cst_185 = arith.constant dense<0.000000e+00> : vector<32xf32>
    %248 = vector.multi_reduction <add>, %247, %cst_185 [1] : vector<32x32xf32> to vector<32xf32>
    %249 = vector.shape_cast %248 : vector<32xf32> to vector<32x1xf32>
    %250 = tpu.reciprocal %249 {approx = true} : vector<32x1xf32> -> vector<32x1xf32>
    %251 = arith.mulf %249, %250 : vector<32x1xf32>
    %cst_186 = arith.constant 2.000000e+00 : f32
    %252 = vector.broadcast %cst_186 : f32 to vector<32x1xf32>
    %253 = arith.subf %252, %251 : vector<32x1xf32>
    %254 = arith.mulf %250, %253 : vector<32x1xf32>
    %255 = vector.broadcast %254 : vector<32x1xf32> to vector<32x32xf32>
    %256 = arith.mulf %247, %255 : vector<32x32xf32>
    %cst_187 = arith.constant dense<0.000000e+00> : vector<32x16xf32>
    %257 = tpu.matmul %256, %238, %cst_187 {dimension_numbers = #tpu.dot_dimension_numbers<[1], [0], [0], [1], [0, 0, 1, 1], [], []>} : vector<32x32xf32>, vector<32x16xf32>, vector<32x16xf32> -> vector<32x16xf32>
    %c1_188 = arith.constant 1 : index
    %c0_189 = arith.constant 0 : index
    %c0_190 = arith.constant 0 : index
    %258 = vector.load %arg15[%c1_188, %c0_189, %c0_190] : memref<2x1x32xf32, #tpu.memory_space<vmem>>, vector<1x1x32xf32>
    %259 = vector.shape_cast %258 : vector<1x1x32xf32> to vector<1x32xf32>
    %260 = vector.extract_strided_slice %257 {offsets = [0, 0], sizes = [16, 16], strides = [1, 1]} : vector<32x16xf32> to vector<16x16xf32>
    %c1_191 = arith.constant 1 : index
    %c0_192 = arith.constant 0 : index
    %c0_193 = arith.constant 0 : index
    %c0_194 = arith.constant 0 : index
    %261 = vector.load %arg14[%c1_191, %c0_192, %c0_193, %c0_194] : memref<2x2x16x32xf32, #tpu.memory_space<vmem>>, vector<1x1x16x32xf32>
    %262 = vector.shape_cast %261 : vector<1x1x16x32xf32> to vector<16x32xf32>
    %cst_195 = arith.constant dense<0.000000e+00> : vector<16x32xf32>
    %263 = tpu.matmul %260, %262, %cst_195 {dimension_numbers = #tpu.dot_dimension_numbers<[1], [0], [0], [1], [0, 0, 1, 1], [], []>} : vector<16x16xf32>, vector<16x32xf32>, vector<16x32xf32> -> vector<16x32xf32>
    %264 = vector.broadcast %259 : vector<1x32xf32> to vector<16x32xf32>
    %265 = arith.addf %264, %263 : vector<16x32xf32>
    %266 = vector.extract_strided_slice %257 {offsets = [16, 0], sizes = [16, 16], strides = [1, 1]} : vector<32x16xf32> to vector<16x16xf32>
    %c1_196 = arith.constant 1 : index
    %c1_197 = arith.constant 1 : index
    %c0_198 = arith.constant 0 : index
    %c0_199 = arith.constant 0 : index
    %267 = vector.load %arg14[%c1_196, %c1_197, %c0_198, %c0_199] : memref<2x2x16x32xf32, #tpu.memory_space<vmem>>, vector<1x1x16x32xf32>
    %268 = vector.shape_cast %267 : vector<1x1x16x32xf32> to vector<16x32xf32>
    %cst_200 = arith.constant dense<0.000000e+00> : vector<16x32xf32>
    %269 = tpu.matmul %266, %268, %cst_200 {dimension_numbers = #tpu.dot_dimension_numbers<[1], [0], [0], [1], [0, 0, 1, 1], [], []>} : vector<16x16xf32>, vector<16x32xf32>, vector<16x32xf32> -> vector<16x32xf32>
    %270 = arith.addf %265, %269 : vector<16x32xf32>
    %271 = arith.addf %270, %193 : vector<16x32xf32>
    %c1_201 = arith.constant 1 : index
    %c0_202 = arith.constant 0 : index
    %c0_203 = arith.constant 0 : index
    %272 = vector.load %arg16[%c1_201, %c0_202, %c0_203] : memref<2x1x32xf32, #tpu.memory_space<vmem>>, vector<1x1x32xf32>
    %273 = vector.shape_cast %272 : vector<1x1x32xf32> to vector<1x32xf32>
    %c1_204 = arith.constant 1 : index
    %c0_205 = arith.constant 0 : index
    %c0_206 = arith.constant 0 : index
    %274 = vector.load %arg17[%c1_204, %c0_205, %c0_206] : memref<2x1x32xf32, #tpu.memory_space<vmem>>, vector<1x1x32xf32>
    %275 = vector.shape_cast %274 : vector<1x1x32xf32> to vector<1x32xf32>
    %cst_207 = arith.constant dense<0.000000e+00> : vector<16xf32>
    %276 = vector.multi_reduction <add>, %271, %cst_207 [1] : vector<16x32xf32> to vector<16xf32>
    %277 = vector.shape_cast %276 : vector<16xf32> to vector<16x1xf32>
    %cst_208 = arith.constant 3.200000e+01 : f32
    %278 = vector.broadcast %cst_208 : f32 to vector<16x1xf32>
    %279 = arith.divf %277, %278 : vector<16x1xf32>
    %280 = vector.broadcast %279 : vector<16x1xf32> to vector<16x32xf32>
    %281 = arith.subf %271, %280 : vector<16x32xf32>
    %282 = arith.mulf %281, %281 : vector<16x32xf32>
    %cst_209 = arith.constant dense<0.000000e+00> : vector<16xf32>
    %283 = vector.multi_reduction <add>, %282, %cst_209 [1] : vector<16x32xf32> to vector<16xf32>
    %284 = vector.shape_cast %283 : vector<16xf32> to vector<16x1xf32>
    %cst_210 = arith.constant 3.200000e+01 : f32
    %285 = vector.broadcast %cst_210 : f32 to vector<16x1xf32>
    %286 = arith.divf %284, %285 : vector<16x1xf32>
    %287 = vector.broadcast %279 : vector<16x1xf32> to vector<16x32xf32>
    %288 = arith.subf %271, %287 : vector<16x32xf32>
    %cst_211 = arith.constant 9.99999996E-13 : f32
    %289 = vector.broadcast %cst_211 : f32 to vector<16x1xf32>
    %290 = arith.addf %286, %289 : vector<16x1xf32>
    %291 = math.rsqrt %290 : vector<16x1xf32>
    %292 = vector.broadcast %291 : vector<16x1xf32> to vector<16x32xf32>
    %293 = arith.mulf %288, %292 : vector<16x32xf32>
    %294 = vector.broadcast %273 : vector<1x32xf32> to vector<16x32xf32>
    %295 = arith.mulf %293, %294 : vector<16x32xf32>
    %296 = vector.broadcast %275 : vector<1x32xf32> to vector<16x32xf32>
    %297 = arith.addf %295, %296 : vector<16x32xf32>
    %c1_212 = arith.constant 1 : index
    %c0_213 = arith.constant 0 : index
    %c0_214 = arith.constant 0 : index
    %298 = vector.load %arg18[%c1_212, %c0_213, %c0_214] : memref<2x32x64xf32, #tpu.memory_space<vmem>>, vector<1x32x64xf32>
    %299 = vector.shape_cast %298 : vector<1x32x64xf32> to vector<32x64xf32>
    %cst_215 = arith.constant dense<0.000000e+00> : vector<16x64xf32>
    %300 = tpu.matmul %297, %299, %cst_215 {dimension_numbers = #tpu.dot_dimension_numbers<[1], [0], [0], [1], [0, 0, 1, 1], [], []>} : vector<16x32xf32>, vector<32x64xf32>, vector<16x64xf32> -> vector<16x64xf32>
    %c1_216 = arith.constant 1 : index
    %c0_217 = arith.constant 0 : index
    %c0_218 = arith.constant 0 : index
    %301 = vector.load %arg19[%c1_216, %c0_217, %c0_218] : memref<2x1x64xf32, #tpu.memory_space<vmem>>, vector<1x1x64xf32>
    %302 = vector.shape_cast %301 : vector<1x1x64xf32> to vector<1x64xf32>
    %303 = vector.broadcast %302 : vector<1x64xf32> to vector<16x64xf32>
    %304 = arith.addf %300, %303 : vector<16x64xf32>
    %cst_219 = arith.constant 5.000000e-01 : f32
    %305 = vector.broadcast %cst_219 : f32 to vector<16x64xf32>
    %306 = arith.mulf %305, %304 : vector<16x64xf32>
    %cst_220 = arith.constant 4.471500e-02 : f32
    %307 = vector.broadcast %cst_220 : f32 to vector<16x64xf32>
    %308 = arith.mulf %307, %304 : vector<16x64xf32>
    %309 = arith.mulf %308, %304 : vector<16x64xf32>
    %310 = arith.mulf %309, %304 : vector<16x64xf32>
    %311 = arith.addf %304, %310 : vector<16x64xf32>
    %cst_221 = arith.constant 0.797884583 : f32
    %312 = vector.broadcast %cst_221 : f32 to vector<16x64xf32>
    %313 = arith.mulf %312, %311 : vector<16x64xf32>
    %314 = math.tanh %313 : vector<16x64xf32>
    %cst_222 = arith.constant 1.000000e+00 : f32
    %315 = vector.broadcast %cst_222 : f32 to vector<16x64xf32>
    %316 = arith.addf %315, %314 : vector<16x64xf32>
    %317 = arith.mulf %306, %316 : vector<16x64xf32>
    %c1_223 = arith.constant 1 : index
    %c0_224 = arith.constant 0 : index
    %c0_225 = arith.constant 0 : index
    %318 = vector.load %arg20[%c1_223, %c0_224, %c0_225] : memref<2x64x32xf32, #tpu.memory_space<vmem>>, vector<1x64x32xf32>
    %319 = vector.shape_cast %318 : vector<1x64x32xf32> to vector<64x32xf32>
    %cst_226 = arith.constant dense<0.000000e+00> : vector<16x32xf32>
    %320 = tpu.matmul %317, %319, %cst_226 {dimension_numbers = #tpu.dot_dimension_numbers<[1], [0], [0], [1], [0, 0, 1, 1], [], []>} : vector<16x64xf32>, vector<64x32xf32>, vector<16x32xf32> -> vector<16x32xf32>
    %c1_227 = arith.constant 1 : index
    %c0_228 = arith.constant 0 : index
    %c0_229 = arith.constant 0 : index
    %321 = vector.load %arg21[%c1_227, %c0_228, %c0_229] : memref<2x1x32xf32, #tpu.memory_space<vmem>>, vector<1x1x32xf32>
    %322 = vector.shape_cast %321 : vector<1x1x32xf32> to vector<1x32xf32>
    %323 = vector.broadcast %322 : vector<1x32xf32> to vector<16x32xf32>
    %324 = arith.addf %320, %323 : vector<16x32xf32>
    %325 = arith.addf %324, %297 : vector<16x32xf32>
    %c1_230 = arith.constant 1 : index
    %c0_231 = arith.constant 0 : index
    %c0_232 = arith.constant 0 : index
    %326 = vector.load %arg22[%c1_230, %c0_231, %c0_232] : memref<2x1x32xf32, #tpu.memory_space<vmem>>, vector<1x1x32xf32>
    %327 = vector.shape_cast %326 : vector<1x1x32xf32> to vector<1x32xf32>
    %c1_233 = arith.constant 1 : index
    %c0_234 = arith.constant 0 : index
    %c0_235 = arith.constant 0 : index
    %328 = vector.load %arg23[%c1_233, %c0_234, %c0_235] : memref<2x1x32xf32, #tpu.memory_space<vmem>>, vector<1x1x32xf32>
    %329 = vector.shape_cast %328 : vector<1x1x32xf32> to vector<1x32xf32>
    %cst_236 = arith.constant dense<0.000000e+00> : vector<16xf32>
    %330 = vector.multi_reduction <add>, %325, %cst_236 [1] : vector<16x32xf32> to vector<16xf32>
    %331 = vector.shape_cast %330 : vector<16xf32> to vector<16x1xf32>
    %cst_237 = arith.constant 3.200000e+01 : f32
    %332 = vector.broadcast %cst_237 : f32 to vector<16x1xf32>
    %333 = arith.divf %331, %332 : vector<16x1xf32>
    %334 = vector.broadcast %333 : vector<16x1xf32> to vector<16x32xf32>
    %335 = arith.subf %325, %334 : vector<16x32xf32>
    %336 = arith.mulf %335, %335 : vector<16x32xf32>
    %cst_238 = arith.constant dense<0.000000e+00> : vector<16xf32>
    %337 = vector.multi_reduction <add>, %336, %cst_238 [1] : vector<16x32xf32> to vector<16xf32>
    %338 = vector.shape_cast %337 : vector<16xf32> to vector<16x1xf32>
    %cst_239 = arith.constant 3.200000e+01 : f32
    %339 = vector.broadcast %cst_239 : f32 to vector<16x1xf32>
    %340 = arith.divf %338, %339 : vector<16x1xf32>
    %341 = vector.broadcast %333 : vector<16x1xf32> to vector<16x32xf32>
    %342 = arith.subf %325, %341 : vector<16x32xf32>
    %cst_240 = arith.constant 9.99999996E-13 : f32
    %343 = vector.broadcast %cst_240 : f32 to vector<16x1xf32>
    %344 = arith.addf %340, %343 : vector<16x1xf32>
    %345 = math.rsqrt %344 : vector<16x1xf32>
    %346 = vector.broadcast %345 : vector<16x1xf32> to vector<16x32xf32>
    %347 = arith.mulf %342, %346 : vector<16x32xf32>
    %348 = vector.broadcast %327 : vector<1x32xf32> to vector<16x32xf32>
    %349 = arith.mulf %347, %348 : vector<16x32xf32>
    %350 = vector.broadcast %329 : vector<1x32xf32> to vector<16x32xf32>
    %351 = arith.addf %349, %350 : vector<16x32xf32>
    %c0_241 = arith.constant 0 : index
    %c0_242 = arith.constant 0 : index
    %352 = vector.load %arg4[%c0_241, %c0_242] : memref<32x128xf32, #tpu.memory_space<vmem>>, vector<32x128xf32>
    %cst_243 = arith.constant dense<0.000000e+00> : vector<16x128xf32>
    %353 = tpu.matmul %351, %352, %cst_243 {dimension_numbers = #tpu.dot_dimension_numbers<[1], [0], [0], [1], [0, 0, 1, 1], [], []>} : vector<16x32xf32>, vector<32x128xf32>, vector<16x128xf32> -> vector<16x128xf32>
    %c0_244 = arith.constant 0 : index
    %c0_245 = arith.constant 0 : index
    %354 = vector.load %arg24[%c0_244, %c0_245] : memref<16x128xf32, #tpu.memory_space<vmem>>, vector<16x128xf32>
    tpu.vector_store %arg24[%c0_244, %c0_245], %353 {strides = array<i32>} : memref<16x128xf32, #tpu.memory_space<vmem>>, vector<16x128xf32>,
    return
  }
  func.func @transform_0(%arg0: i32) -> (i32, i32) {
    %c0_i32 = arith.constant 0 : i32
    %c0_i32_0 = arith.constant 0 : i32
    return %arg0, %c0_i32 : i32, i32
  }
  func.func @transform_1(%arg0: i32) -> (i32, i32) {
    %c0_i32 = arith.constant 0 : i32
    %c0_i32_0 = arith.constant 0 : i32
    return %arg0, %c0_i32 : i32, i32
  }
  func.func @transform_2(%arg0: i32) -> (i32, i32) {
    %c0_i32 = arith.constant 0 : i32
    %c0_i32_0 = arith.constant 0 : i32
    %c0_i32_1 = arith.constant 0 : i32
    return %c0_i32, %c0_i32_0 : i32, i32
  }
  func.func @transform_3(%arg0: i32) -> (i32, i32) {
    %c0_i32 = arith.constant 0 : i32
    %c0_i32_0 = arith.constant 0 : i32
    %c0_i32_1 = arith.constant 0 : i32
    return %c0_i32, %c0_i32_0 : i32, i32
  }
  func.func @transform_4(%arg0: i32) -> (i32, i32) {
    %c0_i32 = arith.constant 0 : i32
    %c0_i32_0 = arith.constant 0 : i32
    %c0_i32_1 = arith.constant 0 : i32
    return %c0_i32, %c0_i32_0 : i32, i32
  }
  func.func @transform_5(%arg0: i32) -> (i32, i32) {
    %c0_i32 = arith.constant 0 : i32
    %c0_i32_0 = arith.constant 0 : i32
    %c0_i32_1 = arith.constant 0 : i32
    return %c0_i32, %c0_i32_0 : i32, i32
  }
  func.func @transform_6(%arg0: i32) -> (i32, i32) {
    %c0_i32 = arith.constant 0 : i32
    %c0_i32_0 = arith.constant 0 : i32
    %c0_i32_1 = arith.constant 0 : i32
    return %c0_i32, %c0_i32_0 : i32, i32
  }
  func.func @transform_7(%arg0: i32) -> (i32, i32, i32, i32) {
    %c0_i32 = arith.constant 0 : i32
    %c0_i32_0 = arith.constant 0 : i32
    %c0_i32_1 = arith.constant 0 : i32
    %c0_i32_2 = arith.constant 0 : i32
    %c0_i32_3 = arith.constant 0 : i32
    return %c0_i32, %c0_i32_0, %c0_i32_1, %c0_i32_2 : i32, i32, i32, i32
  }
  func.func @transform_8(%arg0: i32) -> (i32, i32, i32, i32) {
    %c0_i32 = arith.constant 0 : i32
    %c0_i32_0 = arith.constant 0 : i32
    %c0_i32_1 = arith.constant 0 : i32
    %c0_i32_2 = arith.constant 0 : i32
    %c0_i32_3 = arith.constant 0 : i32
    return %c0_i32, %c0_i32_0, %c0_i32_1, %c0_i32_2 : i32, i32, i32, i32
  }
  func.func @transform_9(%arg0: i32) -> (i32, i32, i32, i32) {
    %c0_i32 = arith.constant 0 : i32
    %c0_i32_0 = arith.constant 0 : i32
    %c0_i32_1 = arith.constant 0 : i32
    %c0_i32_2 = arith.constant 0 : i32
    %c0_i32_3 = arith.constant 0 : i32
    return %c0_i32, %c0_i32_0, %c0_i32_1, %c0_i32_2 : i32, i32, i32, i32
  }
  func.func @transform_10(%arg0: i32) -> (i32, i32, i32, i32) {
    %c0_i32 = arith.constant 0 : i32
    %c0_i32_0 = arith.constant 0 : i32
    %c0_i32_1 = arith.constant 0 : i32
    %c0_i32_2 = arith.constant 0 : i32
    %c0_i32_3 = arith.constant 0 : i32
    return %c0_i32, %c0_i32_0, %c0_i32_1, %c0_i32_2 : i32, i32, i32, i32
  }
  func.func @transform_11(%arg0: i32) -> (i32, i32, i32, i32) {
    %c0_i32 = arith.constant 0 : i32
    %c0_i32_0 = arith.constant 0 : i32
    %c0_i32_1 = arith.constant 0 : i32
    %c0_i32_2 = arith.constant 0 : i32
    %c0_i32_3 = arith.constant 0 : i32
    return %c0_i32, %c0_i32_0, %c0_i32_1, %c0_i32_2 : i32, i32, i32, i32
  }
  func.func @transform_12(%arg0: i32) -> (i32, i32, i32, i32) {
    %c0_i32 = arith.constant 0 : i32
    %c0_i32_0 = arith.constant 0 : i32
    %c0_i32_1 = arith.constant 0 : i32
    %c0_i32_2 = arith.constant 0 : i32
    %c0_i32_3 = arith.constant 0 : i32
    return %c0_i32, %c0_i32_0, %c0_i32_1, %c0_i32_2 : i32, i32, i32, i32
  }
  func.func @transform_13(%arg0: i32) -> (i32, i32, i32, i32) {
    %c0_i32 = arith.constant 0 : i32
    %c0_i32_0 = arith.constant 0 : i32
    %c0_i32_1 = arith.constant 0 : i32
    %c0_i32_2 = arith.constant 0 : i32
    %c0_i32_3 = arith.constant 0 : i32
    return %c0_i32, %c0_i32_0, %c0_i32_1, %c0_i32_2 : i32, i32, i32, i32
  }
  func.func @transform_14(%arg0: i32) -> (i32, i32, i32) {
    %c0_i32 = arith.constant 0 : i32
    %c0_i32_0 = arith.constant 0 : i32
    %c0_i32_1 = arith.constant 0 : i32
    %c0_i32_2 = arith.constant 0 : i32
    return %c0_i32, %c0_i32_0, %c0_i32_1 : i32, i32, i32
  }
  func.func @transform_15(%arg0: i32) -> (i32, i32, i32) {
    %c0_i32 = arith.constant 0 : i32
    %c0_i32_0 = arith.constant 0 : i32
    %c0_i32_1 = arith.constant 0 : i32
    %c0_i32_2 = arith.constant 0 : i32
    return %c0_i32, %c0_i32_0, %c0_i32_1 : i32, i32, i32
  }
  func.func @transform_16(%arg0: i32) -> (i32, i32, i32) {
    %c0_i32 = arith.constant 0 : i32
    %c0_i32_0 = arith.constant 0 : i32
    %c0_i32_1 = arith.constant 0 : i32
    %c0_i32_2 = arith.constant 0 : i32
    return %c0_i32, %c0_i32_0, %c0_i32_1 : i32, i32, i32
  }
  func.func @transform_17(%arg0: i32) -> (i32, i32, i32) {
    %c0_i32 = arith.constant 0 : i32
    %c0_i32_0 = arith.constant 0 : i32
    %c0_i32_1 = arith.constant 0 : i32
    %c0_i32_2 = arith.constant 0 : i32
    return %c0_i32, %c0_i32_0, %c0_i32_1 : i32, i32, i32
  }
  func.func @transform_18(%arg0: i32) -> (i32, i32, i32) {
    %c0_i32 = arith.constant 0 : i32
    %c0_i32_0 = arith.constant 0 : i32
    %c0_i32_1 = arith.constant 0 : i32
    %c0_i32_2 = arith.constant 0 : i32
    return %c0_i32, %c0_i32_0, %c0_i32_1 : i32, i32, i32
  }
  func.func @transform_19(%arg0: i32) -> (i32, i32, i32) {
    %c0_i32 = arith.constant 0 : i32
    %c0_i32_0 = arith.constant 0 : i32
    %c0_i32_1 = arith.constant 0 : i32
    %c0_i32_2 = arith.constant 0 : i32
    return %c0_i32, %c0_i32_0, %c0_i32_1 : i32, i32, i32
  }
  func.func @transform_20(%arg0: i32) -> (i32, i32, i32) {
    %c0_i32 = arith.constant 0 : i32
    %c0_i32_0 = arith.constant 0 : i32
    %c0_i32_1 = arith.constant 0 : i32
    %c0_i32_2 = arith.constant 0 : i32
    return %c0_i32, %c0_i32_0, %c0_i32_1 : i32, i32, i32
  }
  func.func @transform_21(%arg0: i32) -> (i32, i32, i32) {
    %c0_i32 = arith.constant 0 : i32
    %c0_i32_0 = arith.constant 0 : i32
    %c0_i32_1 = arith.constant 0 : i32
    %c0_i32_2 = arith.constant 0 : i32
    return %c0_i32, %c0_i32_0, %c0_i32_1 : i32, i32, i32
  }
  func.func @transform_22(%arg0: i32) -> (i32, i32, i32) {
    %c0_i32 = arith.constant 0 : i32
    %c0_i32_0 = arith.constant 0 : i32
    %c0_i32_1 = arith.constant 0 : i32
    %c0_i32_2 = arith.constant 0 : i32
    return %c0_i32, %c0_i32_0, %c0_i32_1 : i32, i32, i32
  }
  func.func @transform_23(%arg0: i32) -> (i32, i32) {
    %c0_i32 = arith.constant 0 : i32
    %c0_i32_0 = arith.constant 0 : i32
    return %arg0, %c0_i32 : i32, i32
  }
}

</mosaic_0001>

<bundles_post_ra>
// kernel: bert4rec_forward.1
= control target key start
LH: loop header
LB: loop body
LE: loop exit
PB: predicated region body
PF: predicated region fallthrough
CT: control target
= control target key end

     0   :  { %s2541_s0 = inlined_call_operand.vmem [shape: s32[16,1], index: 0, kind: input, shape index: {}]   ;;  %s2542_s1 = inlined_call_operand.vmem [shape: f32[32,32], index: 1, kind: input, shape index: {}]   ;;  %s2543_s2 = inlined_call_operand.vmem [shape: f32[128,32], index: 2, kind: input, shape index: {}]   ;;  %s2544_s3 = inlined_call_operand.vmem [shape: f32[32,128], index: 3, kind: input, shape index: {}]   ;;  %s2545_s4 = inlined_call_operand.vmem [shape: f32[16,32], index: 4, kind: input, shape index: {}]   ;;  %s2546_s5 = inlined_call_operand.vmem [shape: f32[1,32], index: 5, kind: input, shape index: {}]   ;;  %s2547_s6 = inlined_call_operand.vmem [shape: f32[1,32], index: 6, kind: input, shape index: {}]   ;;  %s2548_s7 = inlined_call_operand.vmem [shape: f32[2,2,32,16], index: 7, kind: input, shape index: {}]   ;;  %s2549_s8 = inlined_call_operand.vmem [shape: f32[2,2,1,16], index: 8, kind: input, shape index: {}]   ;;  %s2550_s9 = inlined_call_operand.vmem [shape: f32[2,2,32,16], index: 9, kind: input, shape index: {}]   ;;  %s2551_s10 = inlined_call_operand.vmem [shape: f32[2,2,1,16], index: 10, kind: input, shape index: {}]   ;;  %s2552_s11 = inlined_call_operand.vmem [shape: f32[2,2,32,16], index: 11, kind: input, shape index: {}]   ;;  %s2553_s12 = inlined_call_operand.vmem [shape: f32[2,2,1,16], index: 12, kind: input, shape index: {}]   ;;  %s2554_s13 = inlined_call_operand.vmem [shape: f32[2,2,16,32], index: 13, kind: input, shape index: {}]   ;;  %s2555_s14 = inlined_call_operand.vmem [shape: f32[2,1,32], index: 14, kind: input, shape index: {}]   ;;  %s2556_s15 = inlined_call_operand.vmem [shape: f32[2,1,32], index: 15, kind: input, shape index: {}]   ;;  %s2557_s16 = inlined_call_operand.vmem [shape: f32[2,1,32], index: 16, kind: input, shape index: {}]   ;;  %s2558_s17 = inlined_call_operand.vmem [shape: f32[2,32,64], index: 17, kind: input, shape index: {}]   ;;  %s2559_s18 = inlined_call_operand.vmem [shape: f32[2,1,64], index: 18, kind: input, shape index: {}]   ;;  %s2560_s19 = inlined_call_operand.vmem [shape: f32[2,64,32], index: 19, kind: input, shape index: {}]   ;;  %s2561_s20 = inlined_call_operand.vmem [shape: f32[2,1,32], index: 20, kind: input, shape index: {}]   ;;  %s2562_s21 = inlined_call_operand.vmem [shape: f32[2,1,32], index: 21, kind: input, shape index: {}]   ;;  %s2563_s22 = inlined_call_operand.vmem [shape: f32[2,1,32], index: 22, kind: input, shape index: {}]   ;;  %s2564_s23 = inlined_call_operand.hbm [shape: f32[16,128], index: 23, kind: output, shape index: {}]  }
   0x1   :  { %2571 = sst [smem:[#allocation5_spill]] %s2541_s0 }
   0x2   :  { %2572 = sst [smem:[#allocation6_spill]] %s2542_s1 }
   0x3   :  { %2573 = sst [smem:[#allocation7_spill]] %s2543_s2 }
   0x4   :  { %2574 = sst [smem:[#allocation8_spill]] %s2544_s3 }
   0x5   :  { %2575 = sst [smem:[#allocation9_spill]] %s2545_s4 }
   0x6   :  { %2576 = sst [smem:[#allocation10_spill]] %s2546_s5 }
   0x7   :  { %2577 = sst [smem:[#allocation11_spill]] %s2547_s6 }
   0x8   :  { %2578 = sst [smem:[#allocation12_spill]] %s2548_s7 }
   0x9   :  { %2579 = sst [smem:[#allocation13_spill]] %s2559_s18 }
   0xa   :  { %s2580_s24 = sld [smem:[#allocation5_spill]]  ;;  %v1811_v2 = vmov 0  }
   0xb   :  { %s2581_s18 = sld [smem:[#allocation7_spill]]  ;;  %1694 = vset.pattern.permute.xlu0 %v1811_v2 }
  0x10   :  { %v75_v0 = vld [vmem:[%s2580_s24] sm:$0xff]  ;;  %v76_v6 = vld [vmem:[%s2580_s24 + $0x8] sm:$0xff] }
  0x11   :  { %v106_v1 = vld [vmem:[%s2581_s18 + $0x78] sm:$0xff]  ;;  %v105_v3 = vld [vmem:[%s2581_s18 + $0x70] sm:$0xff]  ;;  %80 = vperm.xlu0 %1694, %v75_v0   ;;  %v104_v4 = vld [vmem:[%s2581_s18 + $0x68] sm:$0xff] }
  0x12   :  { %108 = vmatpush.msra.mxu0 %v106_v1  ;;  %v103_v5 = vld [vmem:[%s2581_s18 + $0x60] sm:$0xff]  ;;  %v102_v7 = vld [vmem:[%s2581_s18 + $0x58] sm:$0xff]  ;;  %v101_v8 = vld [vmem:[%s2581_s18 + $0x50] sm:$0xff] }
  0x13   :  { %v100_v9 = vld [vmem:[%s2581_s18 + $0x48] sm:$0xff]  ;;  %v99_v10 = vld [vmem:[%s2581_s18 + $0x40] sm:$0xff]  ;;  %v98_v11 = vld [vmem:[%s2581_s18 + $0x38] sm:$0xff] }
  0x14   :  { %109 = vmatpush.msra.mxu0 %v105_v3 }
  0x16   :  { %110 = vmatpush.msra.mxu0 %v104_v4 }
  0x18   :  { %111 = vmatpush.msra.mxu0 %v103_v5 }
  0x19   :  { %83 = vperm.xlu0 %1694, %v76_v6  }
  0x1a   :  { %112 = vmatpush.msra.mxu0 %v102_v7 }
  0x1c   :  { %113 = vmatpush.msra.mxu0 %v101_v8 }
  0x1e   :  { %114 = vmatpush.msra.mxu0 %v100_v9 }
  0x20   :  { %115 = vmatpush.msra.mxu0 %v99_v10 }
  0x21   :  { %28 = vsyncpa [#allocation3], 0  ;;  %v97_v12 = vld [vmem:[%s2581_s18 + $0x30] sm:$0xff]  ;;  %v96_v13 = vld [vmem:[%s2581_s18 + $0x28] sm:$0xff]  ;;  %v77_v19 = vlaneseq  ;;  %v1812_v22 = vmov 1.0   ;;  %s2582_s27 = sld [smem:[#allocation9_spill]] }
  0x22   :  { %116 = vmatpush.msra.mxu0 %v98_v11  ;;  %v95_v14 = vld [vmem:[%s2581_s18 + $0x20] sm:$0xff]  ;;  %v94_v15 = vld [vmem:[%s2581_s18 + $0x18] sm:$0xff]  ;;  %v93_v16 = vld [vmem:[%s2581_s18 + $0x10] sm:$0xff]  ;;  %vm133_vm2 = vcmask 261120   ;;  %v1813_v31 = vmov 32.0   ;;  %s2583_s28 = sld [smem:[#allocation12_spill]] }
  0x23   :  { %v92_v17 = vld [vmem:[%s2581_s18 + $0x8] sm:$0xff]  ;;  %v91_v18 = vld [vmem:[%s2581_s18] sm:$0xff]  ;;  %v78_v20 = vand.u32 127, %v77_v19  ;;  %1723 = vrcp.f32 %v1813_v31  ;;  %v239_v49 = vld [vmem:[%s2550_s9 + $0x18] sm:$0xff]  ;;  %s2584_s4 = sld [smem:[#allocation10_spill]]  ;;  %vm397_vm10 = vcmask 130048  }
  0x24   :  { %117 = vmatpush.msra.mxu0 %v97_v12  ;;  %v270_v50 = vld [vmem:[%s2552_s11 + $0x18] sm:$0xff]  ;;  %256 = vmatpush.msra.mxu2 %v239_v49  ;;  %v238_v52 = vld [vmem:[%s2550_s9 + $0x10] sm:$0xff]  ;;  %v237_v55 = vld [vmem:[%s2550_s9 + $0x8] sm:$0xff]  ;;  %s2585_s5 = sld [smem:[#allocation11_spill]]  ;;  %s1815_s3 = smov 128  }
  0x25   :  { %287 = vmatpush.msra.mxu3 %v270_v50  ;;  %v269_v53 = vld [vmem:[%s2552_s11 + $0x10] sm:$0xff]  ;;  %v268_v56 = vld [vmem:[%s2552_s11 + $0x8] sm:$0xff]  ;;  %v236_v58 = vld [vmem:[%s2550_s9] sm:$0xff]  ;;  %s2587_s26 = sld [smem:[#allocation13_spill]] }
  0x26   :  { %118 = vmatpush.msra.mxu0 %v96_v13  ;;  %257 = vmatpush.msra.mxu2 %v238_v52  ;;  %v267_v59 = vld [vmem:[%s2552_s11] sm:$0xff]  ;;  %v1568_v63 = vld [vmem:[%s2550_s9 + $0x38] sm:$0xff]  ;;  %v1567_v0 = vld [vmem:[%s2550_s9 + $0x30] sm:$0xff]  ;;  %s2588_s2 = sld [smem:[#allocation8_spill]] }
  0x27   :  { %v107_v24 = vld [vmem:[%s2582_s27] sm:$0xff]  ;;  %288 = vmatpush.msra.mxu3 %v269_v53  ;;  %v1566_v2 = vld [vmem:[%s2550_s9 + $0x28] sm:$0xff]  ;;  %v1575_v3 = vld [vmem:[%s2552_s11 + $0x38] sm:$0xff] }
  0x28   :  { %119 = vmatpush.msra.mxu0 %v95_v14  ;;  %v202_v48 = vld [vmem:[%s2583_s28 + $0x18] sm:$0xff]  ;;  %v201_v51 = vld [vmem:[%s2583_s28 + $0x10] sm:$0xff]  ;;  %v200_v54 = vld [vmem:[%s2583_s28 + $0x8] sm:$0xff]  ;;  %258 = vmatpush.msra.mxu2 %v237_v55 }
  0x29   :  { %v1724_v32 = vpop.eup %1723  ;;  %225 = vmatpush.msra.mxu1 %v202_v48  ;;  %289 = vmatpush.msra.mxu3 %v268_v56  ;;  %v199_v57 = vld [vmem:[%s2583_s28] sm:$0xff]  ;;  %v1561_v1 = vld [vmem:[%s2583_s28 + $0x38] sm:$0xff]  ;;  %v1560_v4 = vld [vmem:[%s2583_s28 + $0x30] sm:$0xff] }
  0x2a   :  { %120 = vmatpush.msra.mxu0 %v94_v15  ;;  %v141_v33 = vmul.f32 32.0, %v1724_v32  ;;  %vm145_vm3 = vweird.f32 %v1724_v32  ;;  %259 = vmatpush.msra.mxu2 %v236_v58  ;;  %v1574_v5 = vld [vmem:[%s2552_s11 + $0x30] sm:$0xff]  ;;  %v1559_v7 = vld [vmem:[%s2583_s28 + $0x28] sm:$0xff]  ;;  %v1565_v8 = vld [vmem:[%s2550_s9 + $0x20] sm:$0xff] }
  0x2b   :  { %226 = vmatpush.msra.mxu1 %v201_v51  ;;  %290 = vmatpush.msra.mxu3 %v267_v59  ;;  %v1573_v9 = vld [vmem:[%s2552_s11 + $0x28] sm:$0xff]  ;;  %v1558_v11 = vld [vmem:[%s2583_s28 + $0x20] sm:$0xff] }
  0x2c   :  { %121 = vmatpush.msra.mxu0 %v93_v16  ;;  %v142_v34 = vsub.f32 1.0, %v141_v33  ;;  %353 = vmatpush.msrb.mxu2 %v1568_v63  ;;  %v1572_v12 = vld [vmem:[%s2552_s11 + $0x20] sm:$0xff] }
  0x2d   :  { %227 = vmatpush.msra.mxu1 %v200_v54  ;;  %386 = vmatpush.msrb.mxu3 %v1575_v3  ;;  %v1699_v49 = vld [vmem:[%s2553_s12] ss:$0 sm:$0xff]  ;;  %v1700_v63 = vld [vmem:[%s2549_s8 + $0x1] ss:$0 sm:$0xff] }
  0x2e   :  { %122 = vmatpush.msra.mxu0 %v92_v17  ;;  %v143_v35 = vmul.f32 %v1724_v32, %v142_v34  ;;  %354 = vmatpush.msrb.mxu2 %v1567_v0  ;;  %v1698_v54 = vld [vmem:[%s2551_s10] ss:$0 sm:$0xff] }
  0x2f   :  { %228 = vmatpush.msra.mxu1 %v199_v57  ;;  %387 = vmatpush.msrb.mxu3 %v1574_v5  ;;  %v1697_v57 = vld [vmem:[%s2549_s8] ss:$0 sm:$0xff] }
  0x30   :  { %123 = vmatpush.msra.mxu0 %v91_v18  ;;  %v144_v36 = vadd.f32 %v1724_v32, %v143_v35  ;;  %355 = vmatpush.msrb.mxu2 %v1566_v2 }
  0x31   :  { %320 = vmatpush.msrb.mxu1 %v1561_v1  ;;  %388 = vmatpush.msrb.mxu3 %v1573_v9 }
  0x32   :  { %v1996_v37 = vsel %vm145_vm3, %v1724_v32, %v144_v36  ;;  %356 = vmatpush.msrb.mxu2 %v1565_v8 }
  0x33   :  { %321 = vmatpush.msrb.mxu1 %v1560_v4  ;;  %389 = vmatpush.msrb.mxu3 %v1572_v12 }
  0x35   :  { %322 = vmatpush.msrb.mxu1 %v1559_v7 }
  0x37   :  { %323 = vmatpush.msrb.mxu1 %v1558_v11 }
  0x83   :  { %v81_v21 = vpop.permute.xlu0 %80 }
  0x84   :  { %vm85_vm0 = vcmp.eq.s32.totalorder %v78_v20, %v81_v21 }
  0x85   :  { %1550 = vmatmul.msk.f32.vlgmr.msra.gmra.mxu0 %vm85_vm0, %v1812_v22 }
  0x8b   :  { %v84_v23 = vpop.permute.xlu0 %83 }
  0x8c   :  { %vm86_vm1 = vcmp.eq.s32.totalorder %v78_v20, %v84_v23 }
  0x8d   :  { %1551 = vmatmul.msk.f32.gmra.mxu0 %vm86_vm1, %v1812_v22  ;;  %v1695_v22 = vld [vmem:[%s2584_s4] ss:$0 sm:$0xff]  ;;  %vm752_vm1 = vcmask 523264  }
 0x102   :  { %v125_v25 = vpop.f32.mrf.mxu0 }
 0x103   :  { %v126_v26 = vadd.f32 %v125_v25, %v107_v24  ;;  %v1696_v25 = vld [vmem:[%s2585_s5] ss:$0 sm:$0xff]  ;;  %s2586_s5 = sld [smem:[#allocation6_spill]] }
 0x105   :  { %v134_v27 = vsel %vm133_vm2, %v126_v26, 0.0 }
 0x106   :  { %135 = vadd.xlane.f32.xlu1 %v134_v27 }
 0x109   :  { %v2149_v4 = vld [vmem:[%s2586_s5] sm:$0xff]  ;;  %v2156_v9 = vld [vmem:[%s2586_s5 + $0x8] sm:$0xff] }
 0x10a   :  { %v128_v28 = vpop.f32.mrf.mxu0 }
 0x10b   :  { %v129_v29 = vadd.f32 %v128_v28, %v107_v24 }
 0x10d   :  { %v137_v30 = vsel %vm133_vm2, %v129_v29, 0.0 }
 0x10e   :  { %138 = vadd.xlane.f32.xlu1 %v137_v30 }
 0x179   :  { %v136_v38 = vpop.xlane.xlu1 %135 }
 0x17a   :  { %v147_v39 = vmul.f32 %v1996_v37, %v136_v38 }
 0x17c   :  { %v1999_v40 = vsub.f32 %v126_v26, %v147_v39 }
 0x17e   :  { %v151_v41 = vmul.f32 %v1999_v40, %v1999_v40 }
 0x180   :  { %v153_v42 = vsel %vm133_vm2, %v151_v41, 0.0 }
 0x181   :  { %154 = vadd.xlane.f32.xlu2 %v153_v42  ;;  %v139_v43 = vpop.xlane.xlu1 %138 }
 0x182   :  { %v148_v44 = vmul.f32 %v1996_v37, %v139_v43  ;;  %v1701_v43 = vld [vmem:[%s2551_s10 + $0x1] ss:$0 sm:$0xff] }
 0x184   :  { %v2005_v45 = vsub.f32 %v129_v29, %v148_v44  ;;  %v1702_v44 = vld [vmem:[%s2553_s12 + $0x1] ss:$0 sm:$0xff] }
 0x186   :  { %v152_v46 = vmul.f32 %v2005_v45, %v2005_v45 }
 0x188   :  { %v156_v47 = vsel %vm133_vm2, %v152_v46, 0.0 }
 0x189   :  { %157 = vadd.xlane.f32.xlu2 %v156_v47 }
 0x1f4   :  { %v155_v60 = vpop.xlane.xlu2 %154 }
 0x1f5   :  { %v159_v61 = vmul.f32 %v155_v60, %v1996_v37 }
 0x1f7   :  { %v161_v62 = vadd.f32 1e-12, %v159_v61 }
 0x1f9   :  { %1725 = vrsqrt.f32 %v161_v62  ;;  %vm169_vm5 = vweird.f32 %v161_v62 }
 0x1fc   :  { %v158_v6 = vpop.xlane.xlu2 %157 }
 0x1fd   :  { %v160_v10 = vmul.f32 %v158_v6, %v1996_v37 }
 0x1ff   :  { %v1726_v13 = vpop.eup %1725  ;;  %v162_v14 = vadd.f32 1e-12, %v160_v10 }
 0x200   :  { %v164_v15 = vmul.f32 %v1726_v13, %v161_v62  ;;  %vm170_vm4 = vweird.f32 %v1726_v13 }
 0x201   :  { %1727 = vrsqrt.f32 %v162_v14  ;;  %vm171_vm6 = vmor %vm169_vm5, %vm170_vm4  ;;  %vm179_vm8 = vweird.f32 %v162_v14 }
 0x202   :  { %v165_v16 = vmul.f32 %v1726_v13, %v164_v15 }
 0x204   :  { %v166_v17 = vmul.f32 0.5, %v165_v16 }
 0x206   :  { %v167_v18 = vsub.f32 1.5, %v166_v17 }
 0x207   :  { %v1728_v19 = vpop.eup %1727 }
 0x208   :  { %v168_v20 = vmul.f32 %v1726_v13, %v167_v18  ;;  %v174_v21 = vmul.f32 %v1728_v19, %v162_v14  ;;  %vm180_vm7 = vweird.f32 %v1728_v19  ;;  %v2163_v14 = vld [vmem:[%s2586_s5 + $0x10] sm:$0xff] }
 0x209   :  { %vm181_vm9 = vmor %vm179_vm8, %vm180_vm7 }
 0x20a   :  { %v172_v23 = vsel %vm171_vm6, %v1726_v13, %v168_v20  ;;  %v175_v24 = vmul.f32 %v1728_v19, %v174_v21 }
 0x20b   :  { %v183_v26 = vmul.f32 %v172_v23, %v1999_v40 }
 0x20c   :  { %v176_v27 = vmul.f32 0.5, %v175_v24 }
 0x20d   :  { %v188_v28 = vmul.f32 %v1695_v22, %v183_v26 }
 0x20e   :  { %v177_v29 = vsub.f32 1.5, %v176_v27 }
 0x20f   :  { %v2091_v30 = vadd.f32 %v1696_v25, %v188_v28 }
 0x210   :  { %v178_v31 = vmul.f32 %v1728_v19, %v177_v29 }
 0x211   :  { %1552 = vmatmul.msk.f32.vlgmr.msra.gmra.mxu1 %vm133_vm2, %v2091_v30  ;;  %1554 = vmatmul.msk.f32.vlgmr.msra.gmra.mxu2 %vm133_vm2, %v2091_v30 }
 0x212   :  { %v182_v32 = vsel %vm181_vm9, %v1728_v19, %v178_v31  ;;  %1556 = vmatmul.msk.f32.vlgmr.msra.gmra.mxu3 %vm133_vm2, %v2091_v30  ;;  %v2170_v19 = vld [vmem:[%s2586_s5 + $0x18] sm:$0xff] }
 0x213   :  { %v184_v33 = vmul.f32 %v182_v32, %v2005_v45 }
 0x215   :  { %v189_v34 = vmul.f32 %v1695_v22, %v184_v33 }
 0x217   :  { %v2100_v35 = vadd.f32 %v1696_v25, %v189_v34 }
 0x219   :  { %1553 = vmatmul.msk.f32.gmra.mxu1 %vm133_vm2, %v2100_v35  ;;  %1555 = vmatmul.msk.f32.gmra.mxu2 %vm133_vm2, %v2100_v35 }
 0x21a   :  { %1557 = vmatmul.msk.f32.gmra.mxu3 %vm133_vm2, %v2100_v35 }
 0x221   :  { %1563 = vmatmul.msk.f32.vlgmr.msrb.gmra.mxu1 %vm133_vm2, %v2091_v30  ;;  %1570 = vmatmul.msk.f32.vlgmr.msrb.gmra.mxu2 %vm133_vm2, %v2091_v30 }
 0x222   :  { %1577 = vmatmul.msk.f32.vlgmr.msrb.gmra.mxu3 %vm133_vm2, %v2091_v30 }
 0x229   :  { %1564 = vmatmul.msk.f32.gmra.mxu1 %vm133_vm2, %v2100_v35  ;;  %1571 = vmatmul.msk.f32.gmra.mxu2 %vm133_vm2, %v2100_v35 }
 0x22a   :  { %1578 = vmatmul.msk.f32.gmra.mxu3 %vm133_vm2, %v2100_v35 }
 0x28e   :  { %v230_v53 = vpop.f32.mrf.mxu1 }
 0x28f   :  { %v231_v59 = vadd.f32 %v1697_v57, %v230_v53 }
 0x294   :  { %v261_v36 = vpop.f32.mrf.mxu2 }
 0x295   :  { %v292_v38 = vpop.f32.mrf.mxu3  ;;  %v262_v58 = vadd.f32 %v1698_v54, %v261_v36 }
 0x296   :  { %v293_v55 = vadd.f32 %v1699_v49, %v292_v38  ;;  %v233_v60 = vpop.f32.mrf.mxu1 }
 0x297   :  { %v234_v61 = vadd.f32 %v1697_v57, %v233_v60 }
 0x29c   :  { %v264_v39 = vpop.f32.mrf.mxu2 }
 0x29d   :  { %v295_v40 = vpop.f32.mrf.mxu3  ;;  %v265_v56 = vadd.f32 %v1698_v54, %v264_v39 }
 0x29e   :  { %v296_v52 = vadd.f32 %v1699_v49, %v295_v40  ;;  %v325_v62 = vpop.f32.mrf.mxu1 }
 0x29f   :  { %v326_v0 = vadd.f32 %v1700_v63, %v325_v62 }
 0x2a4   :  { %v358_v41 = vpop.f32.mrf.mxu2 }
 0x2a5   :  { %v391_v42 = vpop.f32.mrf.mxu3  ;;  %v359_v51 = vadd.f32 %v1701_v43, %v358_v41 }
 0x2a6   :  { %v392_v50 = vadd.f32 %v1702_v44, %v391_v42  ;;  %v328_v1 = vpop.f32.mrf.mxu1 }
 0x2a7   :  { %v329_v2 = vadd.f32 %v1700_v63, %v328_v1 }
 0x2ac   :  { %v361_v45 = vpop.f32.mrf.mxu2 }
 0x2ad   :  { %v362_v46 = vadd.f32 %v1701_v43, %v361_v45  ;;  %v394_v47 = vpop.f32.mrf.mxu3 }
 0x2ae   :  { %v395_v48 = vadd.f32 %v1702_v44, %v394_v47 }
 0x2af   :  { %1579 = vmatpush.xpose.msk.msra.mxu1 %vm397_vm10, %v362_v46 }
 0x2b0   :  { %539 = vmatpush.msra.mxu2 %v395_v48 }
 0x2b2   :  { %540 = vmatpush.msra.mxu2 %v392_v50  ;;  %v558_v50 = vld [vmem:[%s2554_s13 + $0x8] sm:$0xff] }
 0x2b3   :  { %1580 = vmatpush.xpose.msk.msra.mxu1 %vm397_vm10, %v359_v51  ;;  %579 = vmatpush.msra.mxu3 %v558_v50 }
 0x2b4   :  { %541 = vmatpush.msra.mxu2 %v296_v52 }
 0x2b6   :  { %542 = vmatpush.msra.mxu2 %v293_v55 }
 0x2b7   :  { %1581 = vmatpush.xpose.msk.msra.mxu1 %vm397_vm10, %v265_v56 }
 0x2bb   :  { %1582 = vmatpush.xpose.msk.msra.mxu1 %vm397_vm10, %v262_v58 }
 0x2be   :  { %1583 = vmatmul.msk.f32.vlgmr.msra.gmra.mxu1 %vm397_vm10, %v231_v59 }
 0x2c6   :  { %1584 = vmatmul.msk.f32.gmra.mxu1 %vm397_vm10, %v234_v61 }
 0x2ce   :  { %1585 = vmatmul.msk.f32.gmra.mxu1 %vm397_vm10, %v326_v0 }
 0x2d6   :  { %1586 = vmatmul.msk.f32.gmra.mxu1 %vm397_vm10, %v329_v2 }
 0x33b   :  { %v439_v3 = vpop.f32.mrf.mxu1 }
 0x33c   :  { %v451_v5 = vmul.f32 0.25, %v439_v3 }
 0x33e   :  { %v455_v6 = vadd.f32 %v451_v5, %v2149_v4 }
 0x340   :  { %v459_v7 = vsel %vm133_vm2, %v455_v6, -inf }
 0x341   :  { %460 = vmax.xlane.f32.xlu0 %v459_v7 }
 0x343   :  { %v442_v8 = vpop.f32.mrf.mxu1 }
 0x344   :  { %v452_v10 = vmul.f32 0.25, %v442_v8  ;;  %v557_v8 = vld [vmem:[%s2554_s13] sm:$0xff] }
 0x345   :  { %580 = vmatpush.msra.mxu3 %v557_v8 }
 0x346   :  { %v456_v11 = vadd.f32 %v452_v10, %v2156_v9  ;;  %v1594_v10 = vld [vmem:[%s2554_s13 + $0x18] sm:$0xff] }
 0x347   :  { %616 = vmatpush.msrb.mxu0 %v1594_v10 }
 0x348   :  { %v462_v12 = vsel %vm133_vm2, %v456_v11, -inf }
 0x349   :  { %463 = vmax.xlane.f32.xlu1 %v462_v12 }
 0x34b   :  { %v445_v13 = vpop.f32.mrf.mxu1 }
 0x34c   :  { %v453_v15 = vmul.f32 0.25, %v445_v13 }
 0x34e   :  { %v457_v16 = vadd.f32 %v453_v15, %v2163_v14 }
 0x350   :  { %v465_v17 = vsel %vm133_vm2, %v457_v16, -inf }
 0x351   :  { %466 = vmax.xlane.f32.xlu2 %v465_v17 }
 0x353   :  { %v448_v18 = vpop.f32.mrf.mxu1 }
 0x354   :  { %v454_v20 = vmul.f32 0.25, %v448_v18  ;;  %v1703_v18 = vld [vmem:[%s2555_s14] ss:$0 sm:$0xff] }
 0x356   :  { %v458_v21 = vadd.f32 %v454_v20, %v2170_v19 }
 0x358   :  { %v468_v22 = vsel %vm133_vm2, %v458_v21, -inf }
 0x359   :  { %469 = vmax.xlane.f32.xlu1 %v468_v22 }
 0x3b4   :  { %v461_v23 = vpop.xlane.xlu0 %460 }
 0x3b5   :  { %v471_v24 = vsub.f32 %v455_v6, %v461_v23 }
 0x3b7   :  { %v475_v25 = vmul.f32 1.442695, %v471_v24 }
 0x3b9   :  { %1729 = vpow2.f32 %v475_v25 }
 0x3bc   :  { %v464_v26 = vpop.xlane.xlu1 %463 }
 0x3bd   :  { %v472_v27 = vsub.f32 %v456_v11, %v464_v26  ;;  %v1593_v11 = vld [vmem:[%s2554_s13 + $0x10] sm:$0xff] }
 0x3be   :  { %617 = vmatpush.msrb.mxu0 %v1593_v11 }
 0x3bf   :  { %v1730_v28 = vpop.eup %1729  ;;  %v477_v29 = vmul.f32 1.442695, %v472_v27 }
 0x3c0   :  { %v483_v31 = vsel %vm133_vm2, %v1730_v28, 0.0 }
 0x3c1   :  { %1731 = vpow2.f32 %v477_v29  ;;  %484 = vadd.xlane.f32.xlu2 %v483_v31 }
 0x3c4   :  { %v467_v32 = vpop.xlane.xlu2 %466 }
 0x3c5   :  { %v473_v33 = vsub.f32 %v457_v16, %v467_v32 }
 0x3c7   :  { %v1732_v34 = vpop.eup %1731  ;;  %v479_v36 = vmul.f32 1.442695, %v473_v33 }
 0x3c8   :  { %v486_v38 = vsel %vm133_vm2, %v1732_v34, 0.0 }
 0x3c9   :  { %1733 = vpow2.f32 %v479_v36  ;;  %487 = vadd.xlane.f32.xlu1 %v486_v38 }
 0x3cc   :  { %v470_v39 = vpop.xlane.xlu1 %469 }
 0x3cd   :  { %v474_v40 = vsub.f32 %v458_v21, %v470_v39 }
 0x3cf   :  { %v1734_v41 = vpop.eup %1733  ;;  %v481_v42 = vmul.f32 1.442695, %v474_v40 }
 0x3d0   :  { %v489_v43 = vsel %vm133_vm2, %v1734_v41, 0.0 }
 0x3d1   :  { %1735 = vpow2.f32 %v481_v42  ;;  %490 = vadd.xlane.f32.xlu2 %v489_v43  ;;  %v687_v43 = vld [vmem:[%s2558_s17 + $0x10] sm:$0xff] }
 0x3d7   :  { %v1736_v44 = vpop.eup %1735 }
 0x3d8   :  { %v492_v45 = vsel %vm133_vm2, %v1736_v44, 0.0 }
 0x3d9   :  { %493 = vadd.xlane.f32.xlu1 %v492_v45  ;;  %v685_v45 = vld [vmem:[%s2558_s17] sm:$0xff] }
 0x434   :  { %v485_v46 = vpop.xlane.xlu2 %484 }
 0x435   :  { %1737 = vrcp.f32 %v485_v46 }
 0x43b   :  { %v1738_v47 = vpop.eup %1737 }
 0x43c   :  { %v499_v48 = vmul.f32 %v1738_v47, %v485_v46  ;;  %v488_v49 = vpop.xlane.xlu1 %487 }
 0x43d   :  { %1739 = vrcp.f32 %v488_v49 }
 0x43e   :  { %v503_v51 = vsub.f32 2.0, %v499_v48 }
 0x440   :  { %v507_v52 = vmul.f32 %v1738_v47, %v503_v51 }
 0x442   :  { %v511_v53 = vmul.f32 %v1730_v28, %v507_v52 }
 0x443   :  { %v1740_v54 = vpop.eup %1739 }
 0x444   :  { %v500_v55 = vmul.f32 %v1740_v54, %v488_v49  ;;  %1587 = vmatmul.msk.f32.vlgmr.msra.gmra.mxu2 %vm133_vm2, %v511_v53  ;;  %v491_v56 = vpop.xlane.xlu2 %490 }
 0x445   :  { %1741 = vrcp.f32 %v491_v56 }
 0x446   :  { %v504_v57 = vsub.f32 2.0, %v500_v55 }
 0x448   :  { %v508_v58 = vmul.f32 %v1740_v54, %v504_v57 }
 0x44a   :  { %v512_v59 = vmul.f32 %v1732_v34, %v508_v58 }
 0x44b   :  { %v1742_v60 = vpop.eup %1741 }
 0x44c   :  { %v501_v61 = vmul.f32 %v1742_v60, %v491_v56  ;;  %1588 = vmatmul.msk.f32.gmra.mxu2 %vm133_vm2, %v512_v59  ;;  %v494_v62 = vpop.xlane.xlu1 %493 }
 0x44d   :  { %1743 = vrcp.f32 %v494_v62 }
 0x44e   :  { %v505_v63 = vsub.f32 2.0, %v501_v61 }
 0x450   :  { %v509_v0 = vmul.f32 %v1742_v60, %v505_v63  ;;  %v1704_v60 = vld [vmem:[%s2556_s15] ss:$0 sm:$0xff] }
 0x452   :  { %v513_v1 = vmul.f32 %v1734_v41, %v509_v0  ;;  %v1705_v0 = vld [vmem:[%s2557_s16] ss:$0 sm:$0xff] }
 0x453   :  { %v1744_v2 = vpop.eup %1743 }
 0x454   :  { %v502_v3 = vmul.f32 %v1744_v2, %v494_v62  ;;  %1589 = vmatmul.msk.f32.gmra.mxu2 %vm133_vm2, %v513_v1 }
 0x456   :  { %v506_v5 = vsub.f32 2.0, %v502_v3 }
 0x458   :  { %v510_v6 = vmul.f32 %v1744_v2, %v506_v5 }
 0x45a   :  { %v514_v7 = vmul.f32 %v1736_v44, %v510_v6  ;;  %v686_v44 = vld [vmem:[%s2558_s17 + $0x8] sm:$0xff] }
 0x45c   :  { %1590 = vmatmul.msk.f32.gmra.mxu2 %vm133_vm2, %v514_v7 }
 0x4c7   :  { %v544_v12 = vpop.f32.mrf.mxu2 }
 0x4c8   :  { %1591 = vmatmul.msk.f32.vlgmr.msra.gmra.mxu3 %vm397_vm10, %v544_v12  ;;  %v747_v12 = vld [vmem:[%s2560_s19 + $0x38] sm:$0xff] }
 0x4c9   :  { %767 = vmatpush.msra.mxu0 %v747_v12  ;;  %v1609_v12 = vld [vmem:[%s2550_s9 + $0x48] sm:$0xff] }
 0x4cf   :  { %v547_v13 = vpop.f32.mrf.mxu2 }
 0x4d0   :  { %1592 = vmatmul.msk.f32.gmra.mxu3 %vm397_vm10, %v547_v13  ;;  %v746_v13 = vld [vmem:[%s2560_s19 + $0x30] sm:$0xff] }
 0x4d1   :  { %768 = vmatpush.msra.mxu0 %v746_v13  ;;  %v1616_v13 = vld [vmem:[%s2552_s11 + $0x48] sm:$0xff] }
 0x4d7   :  { %v550_v15 = vpop.f32.mrf.mxu2 }
 0x4d8   :  { %1595 = vmatmul.msk.f32.vlgmr.msrb.gmra.mxu0 %vm397_vm10, %v550_v15  ;;  %v745_v15 = vld [vmem:[%s2560_s19 + $0x28] sm:$0xff] }
 0x4d9   :  { %769 = vmatpush.msra.mxu0 %v745_v15  ;;  %v1623_v15 = vld [vmem:[%s2583_s28 + $0x68] sm:$0xff] }
 0x4df   :  { %v553_v16 = vpop.f32.mrf.mxu2 }
 0x4e0   :  { %1596 = vmatmul.msk.f32.gmra.mxu0 %vm397_vm10, %v553_v16  ;;  %v744_v16 = vld [vmem:[%s2560_s19 + $0x20] sm:$0xff] }
 0x4e1   :  { %770 = vmatpush.msra.mxu0 %v744_v16  ;;  %v1601_v16 = vld [vmem:[%s2583_s28 + $0x40] sm:$0xff] }
 0x54b   :  { %v582_v17 = vpop.f32.mrf.mxu3 }
 0x54c   :  { %v591_v20 = vadd.f32 %v1703_v18, %v582_v17  ;;  %v743_v17 = vld [vmem:[%s2560_s19 + $0x18] sm:$0xff] }
 0x54d   :  { %771 = vmatpush.msra.mxu0 %v743_v17  ;;  %v1608_v17 = vld [vmem:[%s2550_s9 + $0x40] sm:$0xff] }
 0x553   :  { %v585_v24 = vpop.f32.mrf.mxu3 }
 0x554   :  { %v592_v26 = vadd.f32 %v1703_v18, %v585_v24  ;;  %v742_v18 = vld [vmem:[%s2560_s19 + $0x10] sm:$0xff] }
 0x555   :  { %v619_v21 = vpop.f32.mrf.mxu0  ;;  %772 = vmatpush.msra.mxu0 %v742_v18  ;;  %v1615_v18 = vld [vmem:[%s2552_s11 + $0x40] sm:$0xff] }
 0x556   :  { %v625_v22 = vadd.f32 %v619_v21, %v591_v20  ;;  %v741_v20 = vld [vmem:[%s2560_s19 + $0x8] sm:$0xff]  ;;  %v740_v21 = vld [vmem:[%s2560_s19] sm:$0xff] }
 0x557   :  { %773 = vmatpush.msra.mxu0 %v741_v20  ;;  %v1622_v20 = vld [vmem:[%s2583_s28 + $0x60] sm:$0xff] }
 0x558   :  { %v627_v23 = vadd.f32 %v625_v22, %v2091_v30  ;;  %v1706_v22 = vld [vmem:[%s2587_s26] ss:$0 sm:$0xff] }
 0x559   :  { %774 = vmatpush.msra.mxu0 %v740_v21 }
 0x55a   :  { %v631_v25 = vsel %vm133_vm2, %v627_v23, 0.0 }
 0x55b   :  { %632 = vadd.xlane.f32.xlu2 %v631_v25 }
 0x55d   :  { %v622_v27 = vpop.f32.mrf.mxu0 }
 0x55e   :  { %v626_v28 = vadd.f32 %v622_v27, %v592_v26 }
 0x560   :  { %v628_v29 = vadd.f32 %v626_v28, %v2100_v35  ;;  %v688_v35 = vld [vmem:[%s2558_s17 + $0x18] sm:$0xff] }
 0x561   :  { %711 = vmatpush.msrb.mxu3 %v688_v35 }
 0x562   :  { %v634_v31 = vsel %vm133_vm2, %v628_v29, 0.0 }
 0x563   :  { %635 = vadd.xlane.f32.xlu1 %v634_v31  ;;  %712 = vmatpush.msrb.mxu3 %v687_v43 }
 0x565   :  { %713 = vmatpush.msrb.mxu3 %v686_v44 }
 0x567   :  { %714 = vmatpush.msrb.mxu3 %v685_v45 }
 0x5ce   :  { %v633_v32 = vpop.xlane.xlu2 %632 }
 0x5cf   :  { %v637_v33 = vmul.f32 %v633_v32, %v1996_v37 }
 0x5d1   :  { %v639_v34 = vsub.f32 %v627_v23, %v637_v33 }
 0x5d3   :  { %v641_v36 = vmul.f32 %v639_v34, %v639_v34 }
 0x5d5   :  { %v643_v38 = vsel %vm133_vm2, %v641_v36, 0.0 }
 0x5d6   :  { %644 = vadd.xlane.f32.xlu2 %v643_v38  ;;  %v636_v30 = vpop.xlane.xlu1 %635 }
 0x5d7   :  { %v638_v39 = vmul.f32 %v636_v30, %v1996_v37 }
 0x5d9   :  { %v640_v40 = vsub.f32 %v628_v29, %v638_v39 }
 0x5db   :  { %v642_v41 = vmul.f32 %v640_v40, %v640_v40 }
 0x5dd   :  { %v646_v42 = vsel %vm133_vm2, %v642_v41, 0.0 }
 0x5de   :  { %647 = vadd.xlane.f32.xlu1 %v646_v42 }
 0x649   :  { %v645_v46 = vpop.xlane.xlu2 %644 }
 0x64a   :  { %v649_v47 = vmul.f32 %v645_v46, %v1996_v37  ;;  %v1707_v46 = vld [vmem:[%s2561_s20] ss:$0 sm:$0xff] }
 0x64c   :  { %v651_v48 = vadd.f32 1e-12, %v649_v47 }
 0x64e   :  { %1745 = vrsqrt.f32 %v651_v48  ;;  %vm659_vm12 = vweird.f32 %v651_v48 }
 0x651   :  { %v648_v49 = vpop.xlane.xlu1 %647 }
 0x652   :  { %v650_v50 = vmul.f32 %v648_v49, %v1996_v37 }
 0x654   :  { %v1746_v51 = vpop.eup %1745  ;;  %v652_v52 = vadd.f32 1e-12, %v650_v50 }
 0x655   :  { %v654_v53 = vmul.f32 %v1746_v51, %v651_v48  ;;  %vm660_vm11 = vweird.f32 %v1746_v51 }
 0x656   :  { %1747 = vrsqrt.f32 %v652_v52  ;;  %vm661_vm13 = vmor %vm659_vm12, %vm660_vm11  ;;  %vm669_vm15 = vweird.f32 %v652_v52 }
 0x657   :  { %v655_v54 = vmul.f32 %v1746_v51, %v654_v53 }
 0x659   :  { %v656_v55 = vmul.f32 0.5, %v655_v54 }
 0x65b   :  { %v657_v56 = vsub.f32 1.5, %v656_v55  ;;  %v1604_v55 = vld [vmem:[%s2583_s28 + $0x58] sm:$0xff] }
 0x65c   :  { %v1748_v57 = vpop.eup %1747  ;;  %868 = vmatpush.msrb.mxu1 %v1604_v55 }
 0x65d   :  { %v658_v58 = vmul.f32 %v1746_v51, %v657_v56  ;;  %v664_v59 = vmul.f32 %v1748_v57, %v652_v52  ;;  %vm670_vm14 = vweird.f32 %v1748_v57 }
 0x65e   :  { %vm671_vm0 = vmor %vm669_vm15, %vm670_vm14 }
 0x65f   :  { %v662_v61 = vsel %vm661_vm13, %v1746_v51, %v658_v58  ;;  %v665_v62 = vmul.f32 %v1748_v57, %v664_v59 }
 0x660   :  { %v673_v63 = vmul.f32 %v662_v61, %v639_v34 }
 0x661   :  { %v666_v1 = vmul.f32 0.5, %v665_v62 }
 0x662   :  { %v678_v2 = vmul.f32 %v1704_v60, %v673_v63 }
 0x663   :  { %v667_v3 = vsub.f32 1.5, %v666_v1 }
 0x664   :  { %v683_v5 = vadd.f32 %v1705_v0, %v678_v2  ;;  %v1611_v2 = vld [vmem:[%s2550_s9 + $0x58] sm:$0xff] }
 0x665   :  { %v668_v6 = vmul.f32 %v1748_v57, %v667_v3  ;;  %v1618_v3 = vld [vmem:[%s2552_s11 + $0x58] sm:$0xff]  ;;  %901 = vmatpush.msrb.mxu2 %v1611_v2 }
 0x666   :  { %1597 = vmatmul.msk.f32.vlgmr.msrb.gmra.mxu3 %vm133_vm2, %v683_v5 }
 0x667   :  { %v672_v7 = vsel %vm671_vm0, %v1748_v57, %v668_v6  ;;  %934 = vmatpush.msra.mxu3 %v1618_v3  ;;  %v1603_v6 = vld [vmem:[%s2583_s28 + $0x50] sm:$0xff] }
 0x668   :  { %v674_v8 = vmul.f32 %v672_v7, %v640_v40  ;;  %v1610_v7 = vld [vmem:[%s2550_s9 + $0x50] sm:$0xff]  ;;  %869 = vmatpush.msrb.mxu1 %v1603_v6  ;;  %v1715_v6 = vld [vmem:[%s2553_s12 + $0x3] ss:$0 sm:$0xff] }
 0x669   :  { %902 = vmatpush.msrb.mxu2 %v1610_v7 }
 0x66a   :  { %v679_v10 = vmul.f32 %v1704_v60, %v674_v8  ;;  %v1617_v8 = vld [vmem:[%s2552_s11 + $0x50] sm:$0xff] }
 0x66b   :  { %935 = vmatpush.msra.mxu3 %v1617_v8  ;;  %903 = vmatpush.msrb.mxu2 %v1609_v12  ;;  %v1712_v8 = vld [vmem:[%s2551_s10 + $0x2] ss:$0 sm:$0xff] }
 0x66c   :  { %v684_v11 = vadd.f32 %v1705_v0, %v679_v10  ;;  %v1624_v10 = vld [vmem:[%s2583_s28 + $0x70] sm:$0xff]  ;;  %v1713_v12 = vld [vmem:[%s2553_s12 + $0x2] ss:$0 sm:$0xff] }
 0x66d   :  { %936 = vmatpush.msra.mxu3 %v1616_v13  ;;  %904 = vmatpush.msrb.mxu2 %v1608_v17  ;;  %v1710_v17 = vld [vmem:[%s2549_s8 + $0x2] ss:$0 sm:$0xff] }
 0x66e   :  { %1598 = vmatmul.msk.f32.gmra.mxu3 %vm133_vm2, %v684_v11 }
 0x66f   :  { %937 = vmatpush.msra.mxu3 %v1615_v18 }
 0x6e9   :  { %v716_v23 = vpop.f32.mrf.mxu3 }
 0x6ea   :  { %v717_v24 = vadd.f32 %v1706_v22, %v716_v23 }
 0x6ec   :  { %v724_v25 = vmul.f32 0.044715, %v717_v24  ;;  %v722_v40 = vmul.f32 0.5, %v717_v24 }
 0x6ee   :  { %v726_v26 = vmul.f32 %v724_v25, %v717_v24  ;;  %v1631_v25 = vld [vmem:[%s2550_s9 + $0x70] sm:$0xff] }
 0x6f0   :  { %v728_v27 = vmul.f32 %v726_v26, %v717_v24  ;;  %v1630_v26 = vld [vmem:[%s2550_s9 + $0x68] sm:$0xff] }
 0x6f1   :  { %v719_v28 = vpop.f32.mrf.mxu3 }
 0x6f2   :  { %v730_v29 = vadd.f32 %v728_v27, %v717_v24  ;;  %v720_v31 = vadd.f32 %v1706_v22, %v719_v28  ;;  %v1632_v24 = vld [vmem:[%s2550_s9 + $0x78] sm:$0xff]  ;;  %v1638_v28 = vld [vmem:[%s2552_s11 + $0x70] sm:$0xff] }
 0x6f3   :  { %v1639_v27 = vld [vmem:[%s2552_s11 + $0x78] sm:$0xff] }
 0x6f4   :  { %v732_v32 = vmul.f32 0.7978846, %v730_v29  ;;  %v725_v33 = vmul.f32 0.044715, %v720_v31  ;;  %v723_v43 = vmul.f32 0.5, %v720_v31  ;;  %1033 = vmatpush.msra.mxu2 %v1639_v27  ;;  %v1629_v29 = vld [vmem:[%s2550_s9 + $0x60] sm:$0xff] }
 0x6f5   :  { %s1536_s9 = sshll.u32 %s2564_s23, 4  ;;  %s1537_s9 = int_to_ptr.hbm [resolvable:$true] %s1536_s9 }
 0x6f6   :  { %1749 = vtanh.f32 %v732_v32  ;;  %v727_v34 = vmul.f32 %v725_v33, %v720_v31  ;;  %v1637_v32 = vld [vmem:[%s2552_s11 + $0x68] sm:$0xff]  ;;  %1034 = vmatpush.msra.mxu2 %v1638_v28 }
 0x6f8   :  { %v729_v36 = vmul.f32 %v727_v34, %v720_v31  ;;  %v1636_v34 = vld [vmem:[%s2552_s11 + $0x60] sm:$0xff]  ;;  %1035 = vmatpush.msra.mxu2 %v1637_v32  ;;  %s1816_s11 = smov 8  }
 0x6fa   :  { %v731_v38 = vadd.f32 %v729_v36, %v720_v31  ;;  %1036 = vmatpush.msra.mxu2 %v1636_v34 }
 0x6fc   :  { %v1750_v30 = vpop.eup %1749  ;;  %v733_v39 = vmul.f32 0.7978846, %v731_v38 }
 0x6fd   :  { %v736_v41 = vadd.f32 1.0, %v1750_v30 }
 0x6fe   :  { %1751 = vtanh.f32 %v733_v39 }
 0x6ff   :  { %v738_v42 = vmul.f32 %v736_v41, %v722_v40 }
 0x701   :  { %1599 = vmatmul.msk.f32.vlgmr.msra.gmra.mxu0 %vm752_vm1, %v738_v42 }
 0x704   :  { %v1752_v35 = vpop.eup %1751 }
 0x705   :  { %v737_v44 = vadd.f32 1.0, %v1752_v35 }
 0x707   :  { %v739_v45 = vmul.f32 %v737_v44, %v723_v43  ;;  %v1708_v44 = vld [vmem:[%s2562_s21] ss:$0 sm:$0xff] }
 0x709   :  { %1600 = vmatmul.msk.f32.gmra.mxu0 %vm752_vm1, %v739_v45 }
 0x77e   :  { %v776_v47 = vpop.f32.mrf.mxu0 }
 0x77f   :  { %v777_v48 = vadd.f32 %v1707_v46, %v776_v47  ;;  %v1709_v47 = vld [vmem:[%s2563_s22] ss:$0 sm:$0xff] }
 0x781   :  { %v782_v49 = vadd.f32 %v777_v48, %v683_v5  ;;  %v1625_v5 = vld [vmem:[%s2583_s28 + $0x78] sm:$0xff] }
 0x782   :  { %967 = vmatpush.msrb.mxu0 %v1625_v5 }
 0x783   :  { %v786_v50 = vsel %vm133_vm2, %v782_v49, 0.0 }
 0x784   :  { %787 = vadd.xlane.f32.xlu2 %v786_v50  ;;  %968 = vmatpush.msrb.mxu0 %v1624_v10 }
 0x786   :  { %v779_v51 = vpop.f32.mrf.mxu0  ;;  %969 = vmatpush.msrb.mxu0 %v1623_v15 }
 0x787   :  { %v780_v52 = vadd.f32 %v1707_v46, %v779_v51 }
 0x788   :  { %970 = vmatpush.msrb.mxu0 %v1622_v20 }
 0x789   :  { %v783_v53 = vadd.f32 %v780_v52, %v684_v11  ;;  %v1602_v11 = vld [vmem:[%s2583_s28 + $0x48] sm:$0xff] }
 0x78a   :  { %870 = vmatpush.msrb.mxu1 %v1602_v11 }
 0x78b   :  { %v789_v54 = vsel %vm133_vm2, %v783_v53, 0.0 }
 0x78c   :  { %790 = vadd.xlane.f32.xlu0 %v789_v54  ;;  %871 = vmatpush.msrb.mxu1 %v1601_v16 }
 0x78e   :  { %1000 = vmatpush.msra.mxu1 %v1632_v24  ;;  %v1711_v24 = vld [vmem:[%s2549_s8 + $0x3] ss:$0 sm:$0xff] }
 0x790   :  { %1001 = vmatpush.msra.mxu1 %v1631_v25 }
 0x792   :  { %1002 = vmatpush.msra.mxu1 %v1630_v26 }
 0x794   :  { %1003 = vmatpush.msra.mxu1 %v1629_v29 }
 0x7f7   :  { %v788_v56 = vpop.xlane.xlu2 %787 }
 0x7f8   :  { %v792_v57 = vmul.f32 %v788_v56, %v1996_v37 }
 0x7fa   :  { %v2269_v58 = vsub.f32 %v782_v49, %v792_v57 }
 0x7fc   :  { %v796_v59 = vmul.f32 %v2269_v58, %v2269_v58 }
 0x7fe   :  { %v798_v60 = vsel %vm133_vm2, %v796_v59, 0.0 }
 0x7ff   :  { %799 = vadd.xlane.f32.xlu1 %v798_v60  ;;  %v791_v61 = vpop.xlane.xlu0 %790 }
 0x800   :  { %v793_v62 = vmul.f32 %v791_v61, %v1996_v37 }
 0x802   :  { %v2275_v63 = vsub.f32 %v783_v53, %v793_v62 }
 0x804   :  { %v797_v0 = vmul.f32 %v2275_v63, %v2275_v63 }
 0x806   :  { %v801_v1 = vsel %vm133_vm2, %v797_v0, 0.0 }
 0x807   :  { %802 = vadd.xlane.f32.xlu2 %v801_v1  ;;  %v1714_v1 = vld [vmem:[%s2551_s10 + $0x3] ss:$0 sm:$0xff] }
 0x872   :  { %v800_v21 = vpop.xlane.xlu1 %799 }
 0x873   :  { %v804_v22 = vmul.f32 %v800_v21, %v1996_v37 }
 0x875   :  { %v806_v23 = vadd.f32 1e-12, %v804_v22 }
 0x877   :  { %1753 = vrsqrt.f32 %v806_v23  ;;  %vm814_vm4 = vweird.f32 %v806_v23 }
 0x87a   :  { %v803_v31 = vpop.xlane.xlu2 %802 }
 0x87b   :  { %v805_v33 = vmul.f32 %v803_v31, %v1996_v37 }
 0x87d   :  { %v1754_v36 = vpop.eup %1753  ;;  %v807_v38 = vadd.f32 1e-12, %v805_v33 }
 0x87e   :  { %v809_v30 = vmul.f32 %v1754_v36, %v806_v23  ;;  %vm815_vm3 = vweird.f32 %v1754_v36 }
 0x87f   :  { %1755 = vrsqrt.f32 %v807_v38  ;;  %vm816_vm5 = vmor %vm814_vm4, %vm815_vm3  ;;  %vm824_vm7 = vweird.f32 %v807_v38 }
 0x880   :  { %v810_v39 = vmul.f32 %v1754_v36, %v809_v30 }
 0x882   :  { %v811_v40 = vmul.f32 0.5, %v810_v39 }
 0x884   :  { %v812_v41 = vsub.f32 1.5, %v811_v40 }
 0x885   :  { %v1756_v42 = vpop.eup %1755 }
 0x886   :  { %v813_v35 = vmul.f32 %v1754_v36, %v812_v41  ;;  %v819_v43 = vmul.f32 %v1756_v42, %v807_v38  ;;  %vm825_vm6 = vweird.f32 %v1756_v42 }
 0x887   :  { %vm826_vm8 = vmor %vm824_vm7, %vm825_vm6 }
 0x888   :  { %v817_v45 = vsel %vm816_vm5, %v1754_v36, %v813_v35  ;;  %v820_v46 = vmul.f32 %v1756_v42, %v819_v43 }
 0x889   :  { %v828_v48 = vmul.f32 %v817_v45, %v2269_v58 }
 0x88a   :  { %v821_v49 = vmul.f32 0.5, %v820_v46 }
 0x88b   :  { %v833_v50 = vmul.f32 %v1708_v44, %v828_v48 }
 0x88c   :  { %v822_v51 = vsub.f32 1.5, %v821_v49 }
 0x88d   :  { %v2358_v52 = vadd.f32 %v1709_v47, %v833_v50 }
 0x88e   :  { %v823_v53 = vmul.f32 %v1756_v42, %v822_v51 }
 0x88f   :  { %1606 = vmatmul.msk.f32.vlgmr.msrb.gmra.mxu1 %vm133_vm2, %v2358_v52  ;;  %1613 = vmatmul.msk.f32.vlgmr.msrb.gmra.mxu2 %vm133_vm2, %v2358_v52 }
 0x890   :  { %v827_v54 = vsel %vm826_vm8, %v1756_v42, %v823_v53  ;;  %1620 = vmatmul.msk.f32.vlgmr.msra.gmra.mxu3 %vm133_vm2, %v2358_v52  ;;  %1627 = vmatmul.msk.f32.vlgmr.msrb.gmra.mxu0 %vm133_vm2, %v2358_v52 }
 0x891   :  { %v829_v55 = vmul.f32 %v827_v54, %v2275_v63 }
 0x893   :  { %v834_v56 = vmul.f32 %v1708_v44, %v829_v55 }
 0x895   :  { %v2369_v57 = vadd.f32 %v1709_v47, %v834_v56 }
 0x897   :  { %1607 = vmatmul.msk.f32.gmra.mxu1 %vm133_vm2, %v2369_v57  ;;  %1614 = vmatmul.msk.f32.gmra.mxu2 %vm133_vm2, %v2369_v57 }
 0x898   :  { %1621 = vmatmul.msk.f32.gmra.mxu3 %vm133_vm2, %v2369_v57  ;;  %1628 = vmatmul.msk.f32.gmra.mxu0 %vm133_vm2, %v2369_v57 }
 0x89f   :  { %1634 = vmatmul.msk.f32.vlgmr.msra.gmra.mxu1 %vm133_vm2, %v2358_v52  ;;  %1641 = vmatmul.msk.f32.vlgmr.msra.gmra.mxu2 %vm133_vm2, %v2358_v52 }
 0x8a7   :  { %1635 = vmatmul.msk.f32.gmra.mxu1 %vm133_vm2, %v2369_v57  ;;  %1642 = vmatmul.msk.f32.gmra.mxu2 %vm133_vm2, %v2369_v57 }
 0x90c   :  { %v873_v58 = vpop.f32.mrf.mxu1 }
 0x90d   :  { %v874_v21 = vadd.f32 %v1710_v17, %v873_v58  ;;  %v972_v23 = vpop.f32.mrf.mxu0 }
 0x90e   :  { %v973_v25 = vadd.f32 %v1711_v24, %v972_v23 }
 0x912   :  { %v906_v59 = vpop.f32.mrf.mxu2 }
 0x913   :  { %v939_v63 = vpop.f32.mrf.mxu3  ;;  %v907_v18 = vadd.f32 %v1712_v8, %v906_v59 }
 0x914   :  { %v876_v60 = vpop.f32.mrf.mxu1  ;;  %v940_v20 = vadd.f32 %v1713_v12, %v939_v63 }
 0x915   :  { %v877_v22 = vadd.f32 %v1710_v17, %v876_v60  ;;  %v975_v26 = vpop.f32.mrf.mxu0 }
 0x916   :  { %v976_v27 = vadd.f32 %v1711_v24, %v975_v26 }
 0x91a   :  { %v909_v61 = vpop.f32.mrf.mxu2 }
 0x91b   :  { %v942_v11 = vpop.f32.mrf.mxu3  ;;  %v910_v13 = vadd.f32 %v1712_v8, %v909_v61 }
 0x91c   :  { %v1005_v62 = vpop.f32.mrf.mxu1  ;;  %v943_v16 = vadd.f32 %v1713_v12, %v942_v11 }
 0x91d   :  { %v1006_v5 = vadd.f32 %v1714_v1, %v1005_v62 }
 0x922   :  { %v1038_v0 = vpop.f32.mrf.mxu2 }
 0x923   :  { %v1039_v15 = vadd.f32 %v1715_v6, %v1038_v0 }
 0x924   :  { %v1008_v2 = vpop.f32.mrf.mxu1 }
 0x925   :  { %v1009_v3 = vadd.f32 %v1714_v1, %v1008_v2 }
 0x927   :  { %1643 = vmatpush.xpose.msk.msrb.mxu3 %vm397_vm10, %v1009_v3  ;;  %v1657_v3 = vld [vmem:[%s2554_s13 + $0x28] sm:$0xff] }
 0x928   :  { %1227 = vmatpush.msrb.mxu1 %v1657_v3 }
 0x92a   :  { %v1041_v7 = vpop.f32.mrf.mxu2 }
 0x92b   :  { %v1042_v10 = vadd.f32 %v1715_v6, %v1041_v7  ;;  %1644 = vmatpush.xpose.msk.msrb.mxu3 %vm397_vm10, %v1006_v5 }
 0x92d   :  { %1185 = vmatpush.msra.mxu0 %v1042_v10 }
 0x92f   :  { %1645 = vmatpush.xpose.msk.msrb.mxu3 %vm397_vm10, %v910_v13  ;;  %1186 = vmatpush.msra.mxu0 %v1039_v15 }
 0x931   :  { %1187 = vmatpush.msra.mxu0 %v943_v16 }
 0x933   :  { %1646 = vmatpush.xpose.msk.msrb.mxu3 %vm397_vm10, %v907_v18  ;;  %1188 = vmatpush.msra.mxu0 %v940_v20 }
 0x936   :  { %1647 = vmatmul.msk.f32.vlgmr.msrb.gmra.mxu3 %vm397_vm10, %v874_v21 }
 0x93e   :  { %1648 = vmatmul.msk.f32.gmra.mxu3 %vm397_vm10, %v877_v22 }
 0x946   :  { %1649 = vmatmul.msk.f32.gmra.mxu3 %vm397_vm10, %v973_v25 }
 0x94e   :  { %1650 = vmatmul.msk.f32.gmra.mxu3 %vm397_vm10, %v976_v27 }
 0x9b9   :  { %v1085_v28 = vpop.f32.mrf.mxu3 }
 0x9ba   :  { %v1097_v29 = vmul.f32 0.25, %v1085_v28  ;;  %v1656_v28 = vld [vmem:[%s2554_s13 + $0x20] sm:$0xff] }
 0x9bb   :  { %1228 = vmatpush.msrb.mxu1 %v1656_v28  ;;  %v1679_v28 = vld [vmem:[%s2560_s19 + $0x70] sm:$0xff] }
 0x9bc   :  { %v1101_v31 = vadd.f32 %v1097_v29, %v2149_v4  ;;  %v1661_v29 = vld [vmem:[%s2554_s13 + $0x38] sm:$0xff] }
 0x9bd   :  { %1264 = vmatpush.msrb.mxu2 %v1661_v29  ;;  %v1678_v29 = vld [vmem:[%s2560_s19 + $0x68] sm:$0xff] }
 0x9be   :  { %v1105_v32 = vsel %vm133_vm2, %v1101_v31, -inf }
 0x9bf   :  { %1106 = vmax.xlane.f32.xlu0 %v1105_v32 }
 0x9c1   :  { %v1088_v33 = vpop.f32.mrf.mxu3 }
 0x9c2   :  { %v1098_v34 = vmul.f32 0.25, %v1088_v33 }
 0x9c4   :  { %v1102_v36 = vadd.f32 %v1098_v34, %v2156_v9 }
 0x9c6   :  { %v1108_v38 = vsel %vm133_vm2, %v1102_v36, -inf }
 0x9c7   :  { %1109 = vmax.xlane.f32.xlu1 %v1108_v38 }
 0x9c9   :  { %v1091_v30 = vpop.f32.mrf.mxu3 }
 0x9ca   :  { %v1099_v39 = vmul.f32 0.25, %v1091_v30  ;;  %v1716_v30 = vld [vmem:[%s2555_s14 + $0x1] ss:$0 sm:$0xff] }
 0x9cc   :  { %v1103_v40 = vadd.f32 %v1099_v39, %v2163_v14 }
 0x9ce   :  { %v1111_v41 = vsel %vm133_vm2, %v1103_v40, -inf }
 0x9cf   :  { %1112 = vmax.xlane.f32.xlu2 %v1111_v41 }
 0x9d1   :  { %v1094_v42 = vpop.f32.mrf.mxu3 }
 0x9d2   :  { %v1100_v35 = vmul.f32 0.25, %v1094_v42 }
 0x9d4   :  { %v1104_v4 = vadd.f32 %v1100_v35, %v2170_v19 }
 0x9d6   :  { %v1114_v43 = vsel %vm133_vm2, %v1104_v4, -inf }
 0x9d7   :  { %1115 = vmax.xlane.f32.xlu0 %v1114_v43 }
 0xa32   :  { %v1107_v44 = vpop.xlane.xlu0 %1106 }
 0xa33   :  { %v1117_v45 = vsub.f32 %v1101_v31, %v1107_v44  ;;  %v1660_v31 = vld [vmem:[%s2554_s13 + $0x30] sm:$0xff] }
 0xa34   :  { %1265 = vmatpush.msrb.mxu2 %v1660_v31  ;;  %v1677_v31 = vld [vmem:[%s2560_s19 + $0x60] sm:$0xff] }
 0xa35   :  { %v1121_v9 = vmul.f32 1.442695, %v1117_v45 }
 0xa37   :  { %1757 = vpow2.f32 %v1121_v9 }
 0xa3a   :  { %v1110_v46 = vpop.xlane.xlu1 %1109 }
 0xa3b   :  { %v1118_v47 = vsub.f32 %v1102_v36, %v1110_v46 }
 0xa3d   :  { %v1758_v48 = vpop.eup %1757  ;;  %v1123_v49 = vmul.f32 1.442695, %v1118_v47 }
 0xa3e   :  { %v1129_v14 = vsel %vm133_vm2, %v1758_v48, 0.0 }
 0xa3f   :  { %1759 = vpow2.f32 %v1123_v49  ;;  %1130 = vadd.xlane.f32.xlu1 %v1129_v14 }
 0xa42   :  { %v1113_v50 = vpop.xlane.xlu2 %1112 }
 0xa43   :  { %v1119_v51 = vsub.f32 %v1103_v40, %v1113_v50 }
 0xa45   :  { %v1760_v53 = vpop.eup %1759  ;;  %v1125_v54 = vmul.f32 1.442695, %v1119_v51 }
 0xa46   :  { %v1132_v19 = vsel %vm133_vm2, %v1760_v53, 0.0 }
 0xa47   :  { %1761 = vpow2.f32 %v1125_v54  ;;  %1133 = vadd.xlane.f32.xlu2 %v1132_v19 }
 0xa4a   :  { %v1116_v55 = vpop.xlane.xlu0 %1115 }
 0xa4b   :  { %v1120_v56 = vsub.f32 %v1104_v4, %v1116_v55  ;;  %v1668_v55 = vld [vmem:[%s2558_s17 + $0x30] sm:$0xff] }
 0xa4d   :  { %v1762_v58 = vpop.eup %1761  ;;  %v1127_v59 = vmul.f32 1.442695, %v1120_v56  ;;  %v1667_v56 = vld [vmem:[%s2558_s17 + $0x28] sm:$0xff] }
 0xa4e   :  { %v1135_v60 = vsel %vm133_vm2, %v1762_v58, 0.0 }
 0xa4f   :  { %1763 = vpow2.f32 %v1127_v59  ;;  %1136 = vadd.xlane.f32.xlu0 %v1135_v60 }
 0xa55   :  { %v1764_v61 = vpop.eup %1763 }
 0xa56   :  { %v1138_v62 = vsel %vm133_vm2, %v1764_v61, 0.0 }
 0xa57   :  { %1139 = vadd.xlane.f32.xlu1 %v1138_v62 }
 0xab2   :  { %v1131_v63 = vpop.xlane.xlu1 %1130 }
 0xab3   :  { %1765 = vrcp.f32 %v1131_v63 }
 0xab9   :  { %v1766_v0 = vpop.eup %1765 }
 0xaba   :  { %v1145_v1 = vmul.f32 %v1766_v0, %v1131_v63  ;;  %v1134_v2 = vpop.xlane.xlu2 %1133 }
 0xabb   :  { %1767 = vrcp.f32 %v1134_v2 }
 0xabc   :  { %v1149_v5 = vsub.f32 2.0, %v1145_v1 }
 0xabe   :  { %v1153_v6 = vmul.f32 %v1766_v0, %v1149_v5 }
 0xac0   :  { %v1157_v7 = vmul.f32 %v1758_v48, %v1153_v6 }
 0xac1   :  { %v1768_v8 = vpop.eup %1767 }
 0xac2   :  { %v1146_v10 = vmul.f32 %v1768_v8, %v1134_v2  ;;  %1651 = vmatmul.msk.f32.vlgmr.msra.gmra.mxu0 %vm133_vm2, %v1157_v7  ;;  %v1137_v11 = vpop.xlane.xlu0 %1136 }
 0xac3   :  { %1769 = vrcp.f32 %v1137_v11 }
 0xac4   :  { %v1150_v12 = vsub.f32 2.0, %v1146_v10 }
 0xac6   :  { %v1154_v13 = vmul.f32 %v1768_v8, %v1150_v12 }
 0xac8   :  { %v1158_v15 = vmul.f32 %v1760_v53, %v1154_v13 }
 0xac9   :  { %v1770_v16 = vpop.eup %1769 }
 0xaca   :  { %v1147_v17 = vmul.f32 %v1770_v16, %v1137_v11  ;;  %1652 = vmatmul.msk.f32.gmra.mxu0 %vm133_vm2, %v1158_v15  ;;  %v1140_v18 = vpop.xlane.xlu1 %1139  ;;  %v1717_v11 = vld [vmem:[%s2556_s15 + $0x1] ss:$0 sm:$0xff] }
 0xacb   :  { %1771 = vrcp.f32 %v1140_v18 }
 0xacc   :  { %v1151_v20 = vsub.f32 2.0, %v1147_v17 }
 0xace   :  { %v1155_v21 = vmul.f32 %v1770_v16, %v1151_v20  ;;  %v1718_v16 = vld [vmem:[%s2557_s16 + $0x1] ss:$0 sm:$0xff] }
 0xad0   :  { %v1159_v22 = vmul.f32 %v1762_v58, %v1155_v21  ;;  %v1666_v58 = vld [vmem:[%s2558_s17 + $0x20] sm:$0xff] }
 0xad1   :  { %v1772_v23 = vpop.eup %1771 }
 0xad2   :  { %v1148_v24 = vmul.f32 %v1772_v23, %v1140_v18  ;;  %1653 = vmatmul.msk.f32.gmra.mxu0 %vm133_vm2, %v1159_v22 }
 0xad4   :  { %v1152_v25 = vsub.f32 2.0, %v1148_v24 }
 0xad6   :  { %v1156_v26 = vmul.f32 %v1772_v23, %v1152_v25 }
 0xad8   :  { %v1160_v27 = vmul.f32 %v1764_v61, %v1156_v26 }
 0xada   :  { %1654 = vmatmul.msk.f32.gmra.mxu0 %vm133_vm2, %v1160_v27  ;;  %v1680_v27 = vld [vmem:[%s2560_s19 + $0x78] sm:$0xff] }
 0xadb   :  { %1420 = vmatpush.msra.mxu2 %v1680_v27 }
 0xadd   :  { %1421 = vmatpush.msra.mxu2 %v1679_v28 }
 0xadf   :  { %1422 = vmatpush.msra.mxu2 %v1678_v29 }
 0xae1   :  { %1423 = vmatpush.msra.mxu2 %v1677_v31 }
 0xb3f   :  { %v1190_v32 = vpop.f32.mrf.mxu0 }
 0xb40   :  { %1658 = vmatmul.msk.f32.vlgmr.msrb.gmra.mxu1 %vm397_vm10, %v1190_v32  ;;  %v1676_v32 = vld [vmem:[%s2560_s19 + $0x58] sm:$0xff] }
 0xb41   :  { %1424 = vmatpush.msra.mxu2 %v1676_v32 }
 0xb47   :  { %v1193_v33 = vpop.f32.mrf.mxu0 }
 0xb48   :  { %1659 = vmatmul.msk.f32.gmra.mxu1 %vm397_vm10, %v1193_v33  ;;  %v1675_v33 = vld [vmem:[%s2560_s19 + $0x50] sm:$0xff] }
 0xb49   :  { %1425 = vmatpush.msra.mxu2 %v1675_v33  ;;  %v1721_v33 = vld [vmem:[%s2562_s21 + $0x1] ss:$0 sm:$0xff]  ;;  %s1814_s21 = smov [#allocation2]  }
 0xb4f   :  { %v1196_v34 = vpop.f32.mrf.mxu0 }
 0xb50   :  { %1662 = vmatmul.msk.f32.vlgmr.msrb.gmra.mxu2 %vm397_vm10, %v1196_v34  ;;  %v1674_v34 = vld [vmem:[%s2560_s19 + $0x48] sm:$0xff] }
 0xb51   :  { %1426 = vmatpush.msra.mxu2 %v1674_v34 }
 0xb57   :  { %v1199_v36 = vpop.f32.mrf.mxu0 }
 0xb58   :  { %1663 = vmatmul.msk.f32.gmra.mxu2 %vm397_vm10, %v1199_v36  ;;  %v1673_v36 = vld [vmem:[%s2560_s19 + $0x40] sm:$0xff] }
 0xb59   :  { %1427 = vmatpush.msra.mxu2 %v1673_v36 }
 0xbbd   :  { %v1230_v38 = vpop.f32.mrf.mxu1 }
 0xbbe   :  { %v1239_v39 = vadd.f32 %v1716_v30, %v1230_v38  ;;  %v1719_v38 = vld [vmem:[%s2587_s26 + $0x1] ss:$0 sm:$0xff] }
 0xbc5   :  { %v1233_v35 = vpop.f32.mrf.mxu1 }
 0xbc6   :  { %v1240_v43 = vadd.f32 %v1716_v30, %v1233_v35 }
 0xbd3   :  { %v1267_v40 = vpop.f32.mrf.mxu2 }
 0xbd4   :  { %v1273_v41 = vadd.f32 %v1267_v40, %v1239_v39 }
 0xbd6   :  { %v1275_v42 = vadd.f32 %v1273_v41, %v2358_v52 }
 0xbd8   :  { %v1281_v4 = vsel %vm133_vm2, %v1275_v42, 0.0 }
 0xbd9   :  { %1282 = vadd.xlane.f32.xlu2 %v1281_v4 }
 0xbdb   :  { %v1270_v44 = vpop.f32.mrf.mxu2 }
 0xbdc   :  { %v1274_v45 = vadd.f32 %v1270_v44, %v1240_v43 }
 0xbde   :  { %v1276_v9 = vadd.f32 %v1274_v45, %v2369_v57  ;;  %v1669_v57 = vld [vmem:[%s2558_s17 + $0x38] sm:$0xff] }
 0xbdf   :  { %1363 = vmatpush.msra.mxu1 %v1669_v57  ;;  %v1720_v57 = vld [vmem:[%s2561_s20 + $0x1] ss:$0 sm:$0xff] }
 0xbe0   :  { %v1284_v46 = vsel %vm133_vm2, %v1276_v9, 0.0 }
 0xbe1   :  { %1285 = vadd.xlane.f32.xlu0 %v1284_v46  ;;  %1364 = vmatpush.msra.mxu1 %v1668_v55 }
 0xbe3   :  { %1365 = vmatpush.msra.mxu1 %v1667_v56 }
 0xbe5   :  { %1366 = vmatpush.msra.mxu1 %v1666_v58 }
 0xc4c   :  { %v1283_v47 = vpop.xlane.xlu2 %1282 }
 0xc4d   :  { %v1287_v48 = vmul.f32 %v1283_v47, %v1996_v37 }
 0xc4f   :  { %v1289_v49 = vsub.f32 %v1275_v42, %v1287_v48 }
 0xc51   :  { %v1291_v14 = vmul.f32 %v1289_v49, %v1289_v49 }
 0xc53   :  { %v1293_v50 = vsel %vm133_vm2, %v1291_v14, 0.0 }
 0xc54   :  { %1294 = vadd.xlane.f32.xlu1 %v1293_v50  ;;  %v1286_v52 = vpop.xlane.xlu0 %1285 }
 0xc55   :  { %v1288_v51 = vmul.f32 %v1286_v52, %v1996_v37 }
 0xc57   :  { %v1290_v53 = vsub.f32 %v1276_v9, %v1288_v51 }
 0xc59   :  { %v1292_v54 = vmul.f32 %v1290_v53, %v1290_v53 }
 0xc5b   :  { %v1296_v19 = vsel %vm133_vm2, %v1292_v54, 0.0 }
 0xc5c   :  { %1297 = vadd.xlane.f32.xlu2 %v1296_v19 }
 0xcc7   :  { %v1295_v59 = vpop.xlane.xlu1 %1294 }
 0xcc8   :  { %v1299_v60 = vmul.f32 %v1295_v59, %v1996_v37 }
 0xcca   :  { %v1301_v61 = vadd.f32 1e-12, %v1299_v60 }
 0xccc   :  { %1773 = vrsqrt.f32 %v1301_v61  ;;  %vm1309_vm10 = vweird.f32 %v1301_v61 }
 0xccf   :  { %v1298_v62 = vpop.xlane.xlu2 %1297 }
 0xcd0   :  { %v1300_v63 = vmul.f32 %v1298_v62, %v1996_v37 }
 0xcd2   :  { %v1774_v0 = vpop.eup %1773  ;;  %v1302_v1 = vadd.f32 1e-12, %v1300_v63 }
 0xcd3   :  { %v1304_v2 = vmul.f32 %v1774_v0, %v1301_v61  ;;  %vm1310_vm9 = vweird.f32 %v1774_v0 }
 0xcd4   :  { %1775 = vrsqrt.f32 %v1302_v1  ;;  %vm1311_vm11 = vmor %vm1309_vm10, %vm1310_vm9  ;;  %vm1319_vm13 = vweird.f32 %v1302_v1 }
 0xcd5   :  { %v1305_v3 = vmul.f32 %v1774_v0, %v1304_v2 }
 0xcd7   :  { %v1306_v5 = vmul.f32 0.5, %v1305_v3 }
 0xcd9   :  { %v1307_v6 = vsub.f32 1.5, %v1306_v5 }
 0xcda   :  { %v1776_v7 = vpop.eup %1775 }
 0xcdb   :  { %v1308_v8 = vmul.f32 %v1774_v0, %v1307_v6  ;;  %v1314_v10 = vmul.f32 %v1776_v7, %v1302_v1  ;;  %vm1320_vm12 = vweird.f32 %v1776_v7 }
 0xcdc   :  { %vm1321_vm14 = vmor %vm1319_vm13, %vm1320_vm12 }
 0xcdd   :  { %v1312_v12 = vsel %vm1311_vm11, %v1774_v0, %v1308_v8  ;;  %v1315_v13 = vmul.f32 %v1776_v7, %v1314_v10  ;;  %v1498_v0 = vld [vmem:[%s2588_s2 + $0x18] sm:$0xff] }
 0xcde   :  { %v1323_v15 = vmul.f32 %v1312_v12, %v1289_v49  ;;  %1517 = vmatpush.msra.mxu3 %v1498_v0 }
 0xcdf   :  { %v1316_v17 = vmul.f32 0.5, %v1315_v13  ;;  %v1497_v13 = vld [vmem:[%s2588_s2 + $0x10] sm:$0xff] }
 0xce0   :  { %v1328_v18 = vmul.f32 %v1717_v11, %v1323_v15  ;;  %1518 = vmatpush.msra.mxu3 %v1497_v13  ;;  %v1496_v15 = vld [vmem:[%s2588_s2 + $0x8] sm:$0xff] }
 0xce1   :  { %v1317_v20 = vsub.f32 1.5, %v1316_v17 }
 0xce2   :  { %v1333_v21 = vadd.f32 %v1718_v16, %v1328_v18  ;;  %1519 = vmatpush.msra.mxu3 %v1496_v15 }
 0xce3   :  { %v1318_v22 = vmul.f32 %v1776_v7, %v1317_v20 }
 0xce4   :  { %1671 = vmatmul.msk.f32.vlgmr.msra.gmra.mxu1 %vm133_vm2, %v1333_v21 }
 0xce5   :  { %v1322_v23 = vsel %vm1321_vm14, %v1776_v7, %v1318_v22 }
 0xce6   :  { %v1324_v24 = vmul.f32 %v1322_v23, %v1290_v53 }
 0xce8   :  { %v1329_v25 = vmul.f32 %v1717_v11, %v1324_v24 }
 0xcea   :  { %v1334_v26 = vadd.f32 %v1718_v16, %v1329_v25  ;;  %v1495_v16 = vld [vmem:[%s2588_s2] sm:$0xff] }
 0xceb   :  { %1520 = vmatpush.msra.mxu3 %v1495_v16 }
 0xcec   :  { %1672 = vmatmul.msk.f32.gmra.mxu1 %vm133_vm2, %v1334_v26 }
 0xd61   :  { %v1368_v30 = vpop.f32.mrf.mxu1 }
 0xd62   :  { %v1369_v39 = vadd.f32 %v1719_v38, %v1368_v30 }
 0xd64   :  { %v1376_v40 = vmul.f32 0.044715, %v1369_v39  ;;  %v1374_v14 = vmul.f32 0.5, %v1369_v39 }
 0xd66   :  { %v1378_v41 = vmul.f32 %v1376_v40, %v1369_v39 }
 0xd68   :  { %v1380_v42 = vmul.f32 %v1378_v41, %v1369_v39 }
 0xd69   :  { %v1371_v35 = vpop.f32.mrf.mxu1 }
 0xd6a   :  { %v1382_v4 = vadd.f32 %v1380_v42, %v1369_v39  ;;  %v1372_v43 = vadd.f32 %v1719_v38, %v1371_v35  ;;  %v1722_v38 = vld [vmem:[%s2563_s22 + $0x1] ss:$0 sm:$0xff]  ;;  %s1534_s22 = sshll.u32 %s1814_s21, 4  ;;  %s1535_s22 = int_to_ptr.vmem [resolvable:$true] %s1534_s22 }
 0xd6c   :  { %v1384_v44 = vmul.f32 0.7978846, %v1382_v4  ;;  %v1377_v45 = vmul.f32 0.044715, %v1372_v43  ;;  %v1375_v53 = vmul.f32 0.5, %v1372_v43 }
 0xd6e   :  { %1777 = vtanh.f32 %v1384_v44  ;;  %v1379_v9 = vmul.f32 %v1377_v45, %v1372_v43 }
 0xd70   :  { %v1381_v46 = vmul.f32 %v1379_v9, %v1372_v43 }
 0xd72   :  { %v1383_v47 = vadd.f32 %v1381_v46, %v1372_v43 }
 0xd74   :  { %v1778_v48 = vpop.eup %1777  ;;  %v1385_v49 = vmul.f32 0.7978846, %v1383_v47 }
 0xd75   :  { %v1388_v50 = vadd.f32 1.0, %v1778_v48 }
 0xd76   :  { %1779 = vtanh.f32 %v1385_v49 }
 0xd77   :  { %v1390_v52 = vmul.f32 %v1388_v50, %v1374_v14 }
 0xd79   :  { %1682 = vmatmul.msk.f32.vlgmr.msra.gmra.mxu2 %vm752_vm1, %v1390_v52 }
 0xd7c   :  { %v1780_v51 = vpop.eup %1779 }
 0xd7d   :  { %v1389_v54 = vadd.f32 1.0, %v1780_v51 }
 0xd7f   :  { %v1391_v19 = vmul.f32 %v1389_v54, %v1375_v53 }
 0xd81   :  { %1683 = vmatmul.msk.f32.gmra.mxu2 %vm752_vm1, %v1391_v19 }
 0xdfc   :  { %v1429_v55 = vpop.f32.mrf.mxu2 }
 0xdfd   :  { %v1430_v56 = vadd.f32 %v1720_v57, %v1429_v55 }
 0xdff   :  { %v1435_v58 = vadd.f32 %v1430_v56, %v1333_v21 }
 0xe01   :  { %v1441_v59 = vsel %vm133_vm2, %v1435_v58, 0.0 }
 0xe02   :  { %1442 = vadd.xlane.f32.xlu0 %v1441_v59 }
 0xe04   :  { %v1432_v60 = vpop.f32.mrf.mxu2 }
 0xe05   :  { %v1433_v61 = vadd.f32 %v1720_v57, %v1432_v60 }
 0xe07   :  { %v1436_v62 = vadd.f32 %v1433_v61, %v1334_v26 }
 0xe09   :  { %v1444_v63 = vsel %vm133_vm2, %v1436_v62, 0.0 }
 0xe0a   :  { %1445 = vadd.xlane.f32.xlu1 %v1444_v63 }
 0xe75   :  { %v1443_v1 = vpop.xlane.xlu0 %1442 }
 0xe76   :  { %v1447_v2 = vmul.f32 %v1443_v1, %v1996_v37 }
 0xe78   :  { %v1449_v3 = vsub.f32 %v1435_v58, %v1447_v2 }
 0xe7a   :  { %v1451_v5 = vmul.f32 %v1449_v3, %v1449_v3 }
 0xe7c   :  { %v1453_v6 = vsel %vm133_vm2, %v1451_v5, 0.0 }
 0xe7d   :  { %v1446_v7 = vpop.xlane.xlu1 %1445  ;;  %1454 = vadd.xlane.f32.xlu2 %v1453_v6 }
 0xe7e   :  { %v1448_v8 = vmul.f32 %v1446_v7, %v1996_v37 }
 0xe80   :  { %v1450_v10 = vsub.f32 %v1436_v62, %v1448_v8 }
 0xe82   :  { %v1452_v11 = vmul.f32 %v1450_v10, %v1450_v10 }
 0xe84   :  { %v1456_v12 = vsel %vm133_vm2, %v1452_v11, 0.0 }
 0xe85   :  { %1457 = vadd.xlane.f32.xlu0 %v1456_v12 }
 0xef0   :  { %v1455_v17 = vpop.xlane.xlu2 %1454 }
 0xef1   :  { %v1459_v18 = vmul.f32 %v1455_v17, %v1996_v37 }
 0xef3   :  { %v1461_v20 = vadd.f32 1e-12, %v1459_v18 }
 0xef5   :  { %1781 = vrsqrt.f32 %v1461_v20  ;;  %vm1469_vm0 = vweird.f32 %v1461_v20 }
 0xef8   :  { %v1458_v21 = vpop.xlane.xlu0 %1457 }
 0xef9   :  { %v1460_v22 = vmul.f32 %v1458_v21, %v1996_v37 }
 0xefb   :  { %v1782_v23 = vpop.eup %1781  ;;  %v1462_v24 = vadd.f32 1e-12, %v1460_v22 }
 0xefc   :  { %v1464_v25 = vmul.f32 %v1782_v23, %v1461_v20  ;;  %vm1470_vm15 = vweird.f32 %v1782_v23 }
 0xefd   :  { %1783 = vrsqrt.f32 %v1462_v24  ;;  %vm1471_vm1 = vmor %vm1469_vm0, %vm1470_vm15  ;;  %vm1479_vm4 = vweird.f32 %v1462_v24 }
 0xefe   :  { %v1465_v26 = vmul.f32 %v1782_v23, %v1464_v25 }
 0xf00   :  { %v1466_v27 = vmul.f32 0.5, %v1465_v26 }
 0xf02   :  { %v1467_v28 = vsub.f32 1.5, %v1466_v27 }
 0xf03   :  { %v1784_v29 = vpop.eup %1783 }
 0xf04   :  { %v1468_v31 = vmul.f32 %v1782_v23, %v1467_v28  ;;  %v1474_v32 = vmul.f32 %v1784_v29, %v1462_v24  ;;  %vm1480_vm3 = vweird.f32 %v1784_v29 }
 0xf05   :  { %vm1481_vm5 = vmor %vm1479_vm4, %vm1480_vm3 }
 0xf06   :  { %v1472_v34 = vsel %vm1471_vm1, %v1782_v23, %v1468_v31  ;;  %v1475_v36 = vmul.f32 %v1784_v29, %v1474_v32 }
 0xf07   :  { %v1483_v37 = vmul.f32 %v1472_v34, %v1449_v3 }
 0xf08   :  { %v1476_v30 = vmul.f32 0.5, %v1475_v36 }
 0xf09   :  { %v1488_v39 = vmul.f32 %v1721_v33, %v1483_v37 }
 0xf0a   :  { %v1477_v40 = vsub.f32 1.5, %v1476_v30 }
 0xf0b   :  { %v1493_v41 = vadd.f32 %v1722_v38, %v1488_v39 }
 0xf0c   :  { %v1478_v42 = vmul.f32 %v1784_v29, %v1477_v40 }
 0xf0d   :  { %1686 = vmatmul.msk.f32.vlgmr.msra.gmra.mxu3 %vm133_vm2, %v1493_v41 }
 0xf0e   :  { %v1482_v35 = vsel %vm1481_vm5, %v1784_v29, %v1478_v42 }
 0xf0f   :  { %v1484_v4 = vmul.f32 %v1482_v35, %v1450_v10 }
 0xf11   :  { %v1489_v43 = vmul.f32 %v1721_v33, %v1484_v4 }
 0xf13   :  { %v1494_v44 = vadd.f32 %v1722_v38, %v1489_v43 }
 0xf15   :  { %1687 = vmatmul.msk.f32.gmra.mxu3 %vm133_vm2, %v1494_v44 }
 0xf90   :  { %v1522_v45 = vpop.f32.mrf.mxu3 }
 0xf91   :  { %1528 = vst [vmem:[#allocation2] sm:$0xff] %v1522_v45 }
 0xf98   :  { %v1525_v9 = vpop.f32.mrf.mxu3 }
 0xf99   :  { %1529 = vst [vmem:[#allocation2 + $0x8] sm:$0xff] %v1525_v9 }
 0xf9a   :  { %1542 = dma.vmem_to_hbm [thread:$0]  %s1535_s22, 256, %s1537_s9, [#allocation3], %s1815_s3, %s1815_s3, %s1816_s11  }
 0xf9b   :  { %1809 = dma.done.wait [#allocation3], 256  }
 0xf9c   :  { %1810 = vsyncadd [#allocation3], 4294967040 }
 0xf9d   :  { %1547 = vsyncpa [#allocation3], 1 }

</bundles_post_ra>
